<compile_context>
chip_gen: v7x
topology: tpu7x:2x2x1
jax: 0.10.0
libtpu: 0.0.40
codegen_flags: <defaults>
</compile_context>

<pallas_src>
import functools

import jax
import jax.numpy as jnp
import numpy as np
from jax.experimental import pallas as pl
from jax.experimental.pallas import tpu as pltpu


def _round_up(n, m):
    return ((n + m - 1) // m) * m


def _mlp_kernel(x_ref,
                w1_ref, b1_ref,
                w2_ref, b2_ref,
                w3_ref, b3_ref,
                w4_ref, b4_ref,
                w5_ref, b5_ref,
                o_ref,
                *, act_dtype):
    f32 = jnp.float32
    if act_dtype == jnp.dtype(jnp.float32):
        cast = lambda v: v                       # f32 path: zero cast ops emitted
    else:
        cast = lambda v: v.astype(act_dtype)     # bf16 path: tanh runs in bf16

    x = x_ref[...]                               # (D_in, tm)  batch on lanes, f32
    w1 = w1_ref[...]                             # (H, D_in)   f32
    d_in = x.shape[0]

    # ---- layer 1: degenerate contraction (K = D_in, typically 2) -----------
    # Rank-D_in broadcast-FMA on the VPU; avoids MXU push/pop latency for
    # almost-zero work.  Falls back to the MXU if D_in is not tiny.
    if d_in <= 8:
        z1 = w1[:, 0:1] * x[0:1, :]                                   # (H, tm)
        for d in range(1, d_in):
            z1 = z1 + w1[:, d:d + 1] * x[d:d + 1, :]
        z1 = z1 + b1_ref[...]
    else:
        z1 = jnp.dot(w1, x, preferred_element_type=f32) + b1_ref[...]
    y1 = jnp.tanh(cast(z1))                                           # (H, tm)

    # ---- layers 2-4: (H,H) @ (H,tm) on the MXU, f32 accumulate, tanh in
    #      act_dtype (bf16 on v6e/v7x halves the dominant EUP work) ----------
    y2 = jnp.tanh(cast(jnp.dot(w2_ref[...], y1,
                               preferred_element_type=f32) + b2_ref[...]))
    y3 = jnp.tanh(cast(jnp.dot(w3_ref[...], y2,
                               preferred_element_type=f32) + b3_ref[...])) + y1
    y4 = jnp.tanh(cast(jnp.dot(w4_ref[...], y3,
                               preferred_element_type=f32) + b4_ref[...])) + y2

    # ---- output layer: (D_out, H) @ (H, tm) — keep on the MXU (its slot has
    #      huge slack; a VPU formulation would waste 6/8 of each result vreg).
    y = jnp.dot(w5_ref[...], y4, preferred_element_type=f32) + b5_ref[...]

    o_ref[...] = y.astype(o_ref.dtype)                                # lane-dense store


def _choose_tm(N, tm, target_tm):
    """Pick the lane-axis (batch) tile size.

    Explicit tm: validated (multiple of 128).  Otherwise:
      * tiny N  -> single grid step, tm = round_up(N, 128)  (no per-step overhead;
                   too small to feed both v7x TensorCores anyway).
      * large N -> tm sized so the block count is EVEN (balanced split across
                   v7x's two TensorCores) with several steps per core to amortize
                   the ~0.35 us/step pipeline overhead and fatten the DMAs.
    """
    if tm is not None:
        if tm <= 0 or tm % 128 != 0:
            raise ValueError("tm must be a positive multiple of 128 "
                             "(lane-dense batch-on-lanes layout)")
        return tm
    n128 = _round_up(N, 128)
    if n128 <= target_tm:
        return n128                                # single-step fast path
    n_blocks = -(-n128 // target_tm)
    n_blocks += n_blocks % 2                       # even split for 2 TCs (v7x)
    return _round_up(-(-N // n_blocks), 128)


def multilayer_net_forward(x, params, *, tm=None, act_dtype=jnp.float32,
                           x_transposed=False, return_transposed=False,
                           target_tm=2048):
    """Forward pass of MultiLayerNet.

    x:       (N, D_in) float32 collocation points (PyTorch layout), or
             (D_in, N) if x_transposed=True (layout passthrough for callers
             that already hold the batch-on-lanes layout).
    params:  dict with PyTorch-native weight layouts:
               w1 (H, D_in), w2..w4 (H, H), w5 (D_out, H),
               b1..b4 (H, 1), b5 (D_out, 1).
    act_dtype: jnp.float32 (default; exact, right choice on v5e) or
               jnp.bfloat16 (v6e/v7x fast path: bf16 tanh + bf16 MXU feed).
    Returns (N, D_out) float32, or (D_out, N) if return_transposed=True.
    """
    act_dtype = jnp.dtype(act_dtype)

    if x_transposed:
        D_in, N = x.shape
        x_t = x
    else:
        N, D_in = x.shape
        x_t = x.T                                              # (D_in, N)

    H = params["w1"].shape[0]
    D_out = params["w5"].shape[0]

    tm = _choose_tm(N, tm, target_tm)
    n_blocks = pl.cdiv(N, tm)
    N_pad = n_blocks * tm
    if N_pad != N:
        x_t = jnp.pad(x_t, ((0, 0), (0, N_pad - N)))

    # Pre-cast hidden/output weights once in the wrapper (hoists per-step VPU
    # casts out of the kernel; in the bf16 path it also halves weight DMA bytes).
    # w1 and all biases stay f32 (layer 1 is a f32 VPU FMA; biases add into f32).
    if act_dtype == jnp.dtype(jnp.float32):
        w2, w3, w4, w5 = params["w2"], params["w3"], params["w4"], params["w5"]
    else:
        w2, w3, w4, w5 = (params[k].astype(act_dtype)
                          for k in ("w2", "w3", "w4", "w5"))

    consts = (params["w1"], params["b1"], w2, params["b2"], w3, params["b3"],
              w4, params["b4"], w5, params["b5"])

    # Weight/bias blocks use constant index maps, so Pallas does not re-DMA them
    # across grid steps; the redundant second buffer is only ~80 KB, and the
    # whole working set is < 2 MiB even at tm=4096, so tile size is NOT
    # VMEM-gated on v7x's 64 MiB (no vmem_limit_bytes / Buffered(1) needed).
    in_specs = [pl.BlockSpec((D_in, tm), lambda i: (0, i))]
    in_specs += [pl.BlockSpec(c.shape, lambda i: (0, 0)) for c in consts]

    const_bytes = sum(int(np.prod(c.shape)) * c.dtype.itemsize for c in consts)
    cost = pl.CostEstimate(
        flops=2 * N_pad * (D_in * H + 3 * H * H + H * D_out),
        transcendentals=4 * N_pad * H,
        bytes_accessed=4 * N_pad * (D_in + D_out) + const_bytes,
    )

    out_t = pl.pallas_call(
        functools.partial(_mlp_kernel, act_dtype=act_dtype),
        out_shape=jax.ShapeDtypeStruct((D_out, N_pad), jnp.float32),
        grid_spec=pltpu.PrefetchScalarGridSpec(
            num_scalar_prefetch=0,
            grid=(n_blocks,),
            in_specs=in_specs,
            out_specs=pl.BlockSpec((D_out, tm), lambda i: (0, i)),
        ),
        compiler_params=pltpu.CompilerParams(
            dimension_semantics=("parallel",)),
        cost_estimate=cost,
    )(x_t, *consts)

    if N_pad != N:
        out_t = out_t[:, :N]
    return out_t if return_transposed else out_t.T             # (N, D_out)


def init_params(key, D_in, H, D_out):
    """Deterministic init mirroring MultiLayerNet.__init__ (normal weights/biases).

    Weights stored PyTorch-style as (out_features, in_features);
    biases as (out_features, 1) so they broadcast along the lane (batch) axis.
    """
    ks = jax.random.split(key, 10)

    def w(k, fan_in, fan_out):
        std = np.sqrt(2.0 / (fan_in + fan_out))
        return (std * jax.random.normal(k, (fan_out, fan_in))).astype(jnp.float32)

    def b(k, fan_out):
        return jax.random.normal(k, (fan_out, 1)).astype(jnp.float32)  # std=1

    return {
        "w1": w(ks[0], D_in, H), "b1": b(ks[1], H),
        "w2": w(ks[2], H, H),    "b2": b(ks[3], H),
        "w3": w(ks[4], H, H),    "b3": b(ks[5], H),
        "w4": w(ks[6], H, H),    "b4": b(ks[7], H),
        "w5": w(ks[8], H, D_out), "b5": b(ks[9], D_out),
    }


def _reference_forward(x, p):
    """Pure-JAX reference matching the PyTorch forward (y = x @ W^T + b)."""
    y1 = jnp.tanh(x @ p["w1"].T + p["b1"].T)
    y2 = jnp.tanh(y1 @ p["w2"].T + p["b2"].T)
    y3 = jnp.tanh(y2 @ p["w3"].T + p["b3"].T) + y1
    y4 = jnp.tanh(y3 @ p["w4"].T + p["b4"].T) + y2
    return y4 @ p["w5"].T + p["b5"].T


if __name__ == "__main__":
    # Plate-with-hole DEM setup: 2-D coordinates in, 2-D displacement out, H hidden.
    D_in, H, D_out = 2, 32, 2
    N = 1000  # deliberately NOT a multiple of 128 -> exercises lane padding

    key = jax.random.PRNGKey(0)
    k_x, k_p = jax.random.split(key)
    x = jax.random.uniform(k_x, (N, D_in), dtype=jnp.float32)
    params = init_params(k_p, D_in, H, D_out)
    ref = np.asarray(_reference_forward(x, params))

    # 1) Auto tile: tiny-N single-step fast path (tm = round_up(N,128), grid=(1,)).
    out_auto = jax.block_until_ready(multilayer_net_forward(x, params))
    np.testing.assert_allclose(np.asarray(out_auto), ref, rtol=1e-5, atol=1e-5)

    # 2) Explicit small tile: exercises the multi-step grid + padding path
    #    (tm=256 -> 4 parallel steps, two per v7x TensorCore).
    out_tiled = jax.block_until_ready(
        multilayer_net_forward(x, params, tm=256))
    np.testing.assert_allclose(np.asarray(out_tiled), ref, rtol=1e-5, atol=1e-5)

    # 3) bf16-activation path (v6e/v7x fast path: bf16 tanh on the EUP, bf16 MXU
    #    feed).  Looser tolerance by construction (bf16 residual rounding).
    out_bf16 = jax.block_until_ready(
        multilayer_net_forward(x, params, tm=256, act_dtype=jnp.bfloat16))
    np.testing.assert_allclose(np.asarray(out_bf16), ref, rtol=5e-2, atol=2e-1)

    print("KERNEL_OK")
</pallas_src>

<mosaic_0001>
module attributes {stable_mosaic.version = 11 : i64} {
  func.func @_mlp_kernel(%arg0: i32, %arg1: memref<2x1024xf32, #tpu.memory_space<vmem>>, %arg2: memref<32x2xf32, #tpu.memory_space<vmem>>, %arg3: memref<32x1xf32, #tpu.memory_space<vmem>>, %arg4: memref<32x32xf32, #tpu.memory_space<vmem>>, %arg5: memref<32x1xf32, #tpu.memory_space<vmem>>, %arg6: memref<32x32xf32, #tpu.memory_space<vmem>>, %arg7: memref<32x1xf32, #tpu.memory_space<vmem>>, %arg8: memref<32x32xf32, #tpu.memory_space<vmem>>, %arg9: memref<32x1xf32, #tpu.memory_space<vmem>>, %arg10: memref<2x32xf32, #tpu.memory_space<vmem>>, %arg11: memref<2x1xf32, #tpu.memory_space<vmem>>, %arg12: memref<2x1024xf32, #tpu.memory_space<vmem>>) attributes {dimension_semantics = [#tpu.dimension_semantics<parallel>], iteration_bounds = array<i64: 1>, scalar_prefetch = 0 : i64, scratch_operands = 0 : i64, tpu.core_type = #tpu.core_type<tc>, window_params = [{transform_indices = @transform_0, window_bounds = array<i64: 2, 1024>}, {pipeline_mode = #tpu.pipeline_mode<synchronous>, transform_indices = @transform_1, window_bounds = array<i64: 32, 2>}, {pipeline_mode = #tpu.pipeline_mode<synchronous>, transform_indices = @transform_2, window_bounds = array<i64: 32, 1>}, {pipeline_mode = #tpu.pipeline_mode<synchronous>, transform_indices = @transform_3, window_bounds = array<i64: 32, 32>}, {pipeline_mode = #tpu.pipeline_mode<synchronous>, transform_indices = @transform_4, window_bounds = array<i64: 32, 1>}, {pipeline_mode = #tpu.pipeline_mode<synchronous>, transform_indices = @transform_5, window_bounds = array<i64: 32, 32>}, {pipeline_mode = #tpu.pipeline_mode<synchronous>, transform_indices = @transform_6, window_bounds = array<i64: 32, 1>}, {pipeline_mode = #tpu.pipeline_mode<synchronous>, transform_indices = @transform_7, window_bounds = array<i64: 32, 32>}, {pipeline_mode = #tpu.pipeline_mode<synchronous>, transform_indices = @transform_8, window_bounds = array<i64: 32, 1>}, {pipeline_mode = #tpu.pipeline_mode<synchronous>, transform_indices = @transform_9, window_bounds = array<i64: 2, 32>}, {pipeline_mode = #tpu.pipeline_mode<synchronous>, transform_indices = @transform_10, window_bounds = array<i64: 2, 1>}, {transform_indices = @transform_11, window_bounds = array<i64: 2, 1024>}]} {
    %c0 = arith.constant 0 : index
    %c0_0 = arith.constant 0 : index
    %0 = vector.load %arg1[%c0, %c0_0] : memref<2x1024xf32, #tpu.memory_space<vmem>>, vector<2x1024xf32>
    %c0_1 = arith.constant 0 : index
    %c0_2 = arith.constant 0 : index
    %1 = vector.load %arg2[%c0_1, %c0_2] : memref<32x2xf32, #tpu.memory_space<vmem>>, vector<32x2xf32>
    %2 = vector.extract_strided_slice %1 {offsets = [0, 0], sizes = [32, 1], strides = [1, 1]} : vector<32x2xf32> to vector<32x1xf32>
    %3 = vector.extract_strided_slice %0 {offsets = [0, 0], sizes = [1, 1024], strides = [1, 1]} : vector<2x1024xf32> to vector<1x1024xf32>
    %4 = vector.broadcast %2 : vector<32x1xf32> to vector<32x1024xf32>
    %5 = vector.broadcast %3 : vector<1x1024xf32> to vector<32x1024xf32>
    %6 = arith.mulf %4, %5 : vector<32x1024xf32>
    %7 = vector.extract_strided_slice %1 {offsets = [0, 1], sizes = [32, 1], strides = [1, 1]} : vector<32x2xf32> to vector<32x1xf32>
    %8 = vector.extract_strided_slice %0 {offsets = [1, 0], sizes = [1, 1024], strides = [1, 1]} : vector<2x1024xf32> to vector<1x1024xf32>
    %9 = vector.broadcast %7 : vector<32x1xf32> to vector<32x1024xf32>
    %10 = vector.broadcast %8 : vector<1x1024xf32> to vector<32x1024xf32>
    %11 = arith.mulf %9, %10 : vector<32x1024xf32>
    %12 = arith.addf %6, %11 : vector<32x1024xf32>
    %c0_3 = arith.constant 0 : index
    %c0_4 = arith.constant 0 : index
    %13 = vector.load %arg3[%c0_3, %c0_4] : memref<32x1xf32, #tpu.memory_space<vmem>>, vector<32x1xf32>
    %14 = vector.broadcast %13 : vector<32x1xf32> to vector<32x1024xf32>
    %15 = arith.addf %12, %14 : vector<32x1024xf32>
    %16 = math.tanh %15 : vector<32x1024xf32>
    %c0_5 = arith.constant 0 : index
    %c0_6 = arith.constant 0 : index
    %17 = vector.load %arg4[%c0_5, %c0_6] : memref<32x32xf32, #tpu.memory_space<vmem>>, vector<32x32xf32>
    %cst = arith.constant dense<0.000000e+00> : vector<32x1024xf32>
    %18 = tpu.matmul %17, %16, %cst {dimension_numbers = #tpu.dot_dimension_numbers<[1], [0], [0], [1], [0, 0, 1, 1], [], []>} : vector<32x32xf32>, vector<32x1024xf32>, vector<32x1024xf32> -> vector<32x1024xf32>
    %c0_7 = arith.constant 0 : index
    %c0_8 = arith.constant 0 : index
    %19 = vector.load %arg5[%c0_7, %c0_8] : memref<32x1xf32, #tpu.memory_space<vmem>>, vector<32x1xf32>
    %20 = vector.broadcast %19 : vector<32x1xf32> to vector<32x1024xf32>
    %21 = arith.addf %18, %20 : vector<32x1024xf32>
    %22 = math.tanh %21 : vector<32x1024xf32>
    %c0_9 = arith.constant 0 : index
    %c0_10 = arith.constant 0 : index
    %23 = vector.load %arg6[%c0_9, %c0_10] : memref<32x32xf32, #tpu.memory_space<vmem>>, vector<32x32xf32>
    %cst_11 = arith.constant dense<0.000000e+00> : vector<32x1024xf32>
    %24 = tpu.matmul %23, %22, %cst_11 {dimension_numbers = #tpu.dot_dimension_numbers<[1], [0], [0], [1], [0, 0, 1, 1], [], []>} : vector<32x32xf32>, vector<32x1024xf32>, vector<32x1024xf32> -> vector<32x1024xf32>
    %c0_12 = arith.constant 0 : index
    %c0_13 = arith.constant 0 : index
    %25 = vector.load %arg7[%c0_12, %c0_13] : memref<32x1xf32, #tpu.memory_space<vmem>>, vector<32x1xf32>
    %26 = vector.broadcast %25 : vector<32x1xf32> to vector<32x1024xf32>
    %27 = arith.addf %24, %26 : vector<32x1024xf32>
    %28 = math.tanh %27 : vector<32x1024xf32>
    %29 = arith.addf %28, %16 : vector<32x1024xf32>
    %c0_14 = arith.constant 0 : index
    %c0_15 = arith.constant 0 : index
    %30 = vector.load %arg8[%c0_14, %c0_15] : memref<32x32xf32, #tpu.memory_space<vmem>>, vector<32x32xf32>
    %cst_16 = arith.constant dense<0.000000e+00> : vector<32x1024xf32>
    %31 = tpu.matmul %30, %29, %cst_16 {dimension_numbers = #tpu.dot_dimension_numbers<[1], [0], [0], [1], [0, 0, 1, 1], [], []>} : vector<32x32xf32>, vector<32x1024xf32>, vector<32x1024xf32> -> vector<32x1024xf32>
    %c0_17 = arith.constant 0 : index
    %c0_18 = arith.constant 0 : index
    %32 = vector.load %arg9[%c0_17, %c0_18] : memref<32x1xf32, #tpu.memory_space<vmem>>, vector<32x1xf32>
    %33 = vector.broadcast %32 : vector<32x1xf32> to vector<32x1024xf32>
    %34 = arith.addf %31, %33 : vector<32x1024xf32>
    %35 = math.tanh %34 : vector<32x1024xf32>
    %36 = arith.addf %35, %22 : vector<32x1024xf32>
    %c0_19 = arith.constant 0 : index
    %c0_20 = arith.constant 0 : index
    %37 = vector.load %arg10[%c0_19, %c0_20] : memref<2x32xf32, #tpu.memory_space<vmem>>, vector<2x32xf32>
    %cst_21 = arith.constant dense<0.000000e+00> : vector<2x1024xf32>
    %38 = tpu.matmul %37, %36, %cst_21 {dimension_numbers = #tpu.dot_dimension_numbers<[1], [0], [0], [1], [0, 0, 1, 1], [], []>} : vector<2x32xf32>, vector<32x1024xf32>, vector<2x1024xf32> -> vector<2x1024xf32>
    %c0_22 = arith.constant 0 : index
    %c0_23 = arith.constant 0 : index
    %39 = vector.load %arg11[%c0_22, %c0_23] : memref<2x1xf32, #tpu.memory_space<vmem>>, vector<2x1xf32>
    %40 = vector.broadcast %39 : vector<2x1xf32> to vector<2x1024xf32>
    %41 = arith.addf %38, %40 : vector<2x1024xf32>
    %c0_24 = arith.constant 0 : index
    %c0_25 = arith.constant 0 : index
    %42 = vector.load %arg12[%c0_24, %c0_25] : memref<2x1024xf32, #tpu.memory_space<vmem>>, vector<2x1024xf32>
    tpu.vector_store %arg12[%c0_24, %c0_25], %41 {strides = array<i32>} : memref<2x1024xf32, #tpu.memory_space<vmem>>, vector<2x1024xf32>,
    return
  }
  func.func @transform_0(%arg0: i32) -> (i32, i32) {
    %c0_i32 = arith.constant 0 : i32
    %c0_i32_0 = arith.constant 0 : i32
    return %c0_i32, %arg0 : i32, i32
  }
  func.func @transform_1(%arg0: i32) -> (i32, i32) {
    %c0_i32 = arith.constant 0 : i32
    %c0_i32_0 = arith.constant 0 : i32
    %c0_i32_1 = arith.constant 0 : i32
    return %c0_i32, %c0_i32_0 : i32, i32
  }
  func.func @transform_2(%arg0: i32) -> (i32, i32) {
    %c0_i32 = arith.constant 0 : i32
    %c0_i32_0 = arith.constant 0 : i32
    %c0_i32_1 = arith.constant 0 : i32
    return %c0_i32, %c0_i32_0 : i32, i32
  }
  func.func @transform_3(%arg0: i32) -> (i32, i32) {
    %c0_i32 = arith.constant 0 : i32
    %c0_i32_0 = arith.constant 0 : i32
    %c0_i32_1 = arith.constant 0 : i32
    return %c0_i32, %c0_i32_0 : i32, i32
  }
  func.func @transform_4(%arg0: i32) -> (i32, i32) {
    %c0_i32 = arith.constant 0 : i32
    %c0_i32_0 = arith.constant 0 : i32
    %c0_i32_1 = arith.constant 0 : i32
    return %c0_i32, %c0_i32_0 : i32, i32
  }
  func.func @transform_5(%arg0: i32) -> (i32, i32) {
    %c0_i32 = arith.constant 0 : i32
    %c0_i32_0 = arith.constant 0 : i32
    %c0_i32_1 = arith.constant 0 : i32
    return %c0_i32, %c0_i32_0 : i32, i32
  }
  func.func @transform_6(%arg0: i32) -> (i32, i32) {
    %c0_i32 = arith.constant 0 : i32
    %c0_i32_0 = arith.constant 0 : i32
    %c0_i32_1 = arith.constant 0 : i32
    return %c0_i32, %c0_i32_0 : i32, i32
  }
  func.func @transform_7(%arg0: i32) -> (i32, i32) {
    %c0_i32 = arith.constant 0 : i32
    %c0_i32_0 = arith.constant 0 : i32
    %c0_i32_1 = arith.constant 0 : i32
    return %c0_i32, %c0_i32_0 : i32, i32
  }
  func.func @transform_8(%arg0: i32) -> (i32, i32) {
    %c0_i32 = arith.constant 0 : i32
    %c0_i32_0 = arith.constant 0 : i32
    %c0_i32_1 = arith.constant 0 : i32
    return %c0_i32, %c0_i32_0 : i32, i32
  }
  func.func @transform_9(%arg0: i32) -> (i32, i32) {
    %c0_i32 = arith.constant 0 : i32
    %c0_i32_0 = arith.constant 0 : i32
    %c0_i32_1 = arith.constant 0 : i32
    return %c0_i32, %c0_i32_0 : i32, i32
  }
  func.func @transform_10(%arg0: i32) -> (i32, i32) {
    %c0_i32 = arith.constant 0 : i32
    %c0_i32_0 = arith.constant 0 : i32
    %c0_i32_1 = arith.constant 0 : i32
    return %c0_i32, %c0_i32_0 : i32, i32
  }
  func.func @transform_11(%arg0: i32) -> (i32, i32) {
    %c0_i32 = arith.constant 0 : i32
    %c0_i32_0 = arith.constant 0 : i32
    return %c0_i32, %arg0 : i32, i32
  }
}

</mosaic_0001>

<bundles_post_ra>
// kernel: tpu_custom_call.1
= control target key start
LH: loop header
LB: loop body
LE: loop exit
PB: predicated region body
PF: predicated region fallthrough
CT: control target
= control target key end

     0   :  { %v2585_v2 = vmov 1   ;;  %v2586_v4 = vmov 0   ;;  %s3524_s0 = inlined_call_operand.vmem [shape: f32[2,1024], index: 0, kind: input, shape index: {}]   ;;  %s3525_s1 = inlined_call_operand.vmem [shape: f32[32,2], index: 1, kind: input, shape index: {}]   ;;  %s3526_s2 = inlined_call_operand.vmem [shape: f32[32,1], index: 2, kind: input, shape index: {}]   ;;  %s3527_s3 = inlined_call_operand.vmem [shape: f32[32,32], index: 3, kind: input, shape index: {}]   ;;  %s3528_s4 = inlined_call_operand.vmem [shape: f32[32,1], index: 4, kind: input, shape index: {}]   ;;  %s3529_s5 = inlined_call_operand.vmem [shape: f32[32,32], index: 5, kind: input, shape index: {}]   ;;  %s3530_s6 = inlined_call_operand.vmem [shape: f32[32,1], index: 6, kind: input, shape index: {}]   ;;  %s3531_s7 = inlined_call_operand.vmem [shape: f32[32,32], index: 7, kind: input, shape index: {}]   ;;  %s3532_s8 = inlined_call_operand.vmem [shape: f32[32,1], index: 8, kind: input, shape index: {}]   ;;  %s3533_s9 = inlined_call_operand.vmem [shape: f32[2,32], index: 9, kind: input, shape index: {}]   ;;  %s3534_s10 = inlined_call_operand.vmem [shape: f32[2,1], index: 10, kind: input, shape index: {}]   ;;  %s3535_s11 = inlined_call_operand.hbm [shape: f32[2,1024], index: 11, kind: output, shape index: {}]  }
   0x1   :  { %v43_v0 = vld [vmem:[%s3525_s1 + $0x10] sm:$0xff]  ;;  %v41_v1 = vld [vmem:[%s3525_s1] sm:$0xff]  ;;  %2301 = vset.pattern.permute.xlu0 %v2585_v2  ;;  %2299 = vset.pattern.permute.xlu1 %v2585_v2  ;;  %v42_v3 = vld [vmem:[%s3525_s1 + $0x8] sm:$0xff] }
   0x2   :  { %180 = vperm.xlu0 %2301, %v43_v0   ;;  %172 = vperm.xlu1 %2299, %v41_v1  }
   0x6   :  { %2302 = vset.pattern.permute.xlu0 %v2586_v4  ;;  %176 = vperm.xlu1 %2299, %v42_v3  }
   0x7   :  { %47 = vperm.xlu0 %2302, %v41_v1  }
   0x8   :  { %16 = vsyncpa [#allocation3], 0  ;;  %v44_v5 = vld [vmem:[%s3525_s1 + $0x18] sm:$0xff]  ;;  %v324_v6 = vld [vmem:[%s3526_s2 + $0x8] sm:$0xff]  ;;  %v3536_v23 = vmov 0.0   ;;  %v67_v24 = vlaneseq  ;;  %vm439_vm0 = vcmask 261120  }
   0x9   :  { %v323_v7 = vld [vmem:[%s3526_s2] sm:$0xff]  ;;  %v325_v9 = vld [vmem:[%s3526_s2 + $0x10] sm:$0xff]  ;;  %v326_v11 = vld [vmem:[%s3526_s2 + $0x18] sm:$0xff]  ;;  %516 = vmatprep.mubr.f32.mxu0 %v3536_v23  ;;  %605 = vmatprep.mubr.f32.mxu1 %v3536_v23 }
   0xa   :  { %2300 = vset.pattern.permute.xlu1 %v2586_v4  ;;  %v415_v8 = vld [vmem:[%s3528_s4] sm:$0xff]  ;;  %v417_v10 = vld [vmem:[%s3528_s4 + $0x10] sm:$0xff]  ;;  %v416_v13 = vld [vmem:[%s3528_s4 + $0x8] sm:$0xff]  ;;  %v2715_v25 = vshrl.u32 %v67_v24, 7 }
   0xb   :  { %52 = vperm.xlu0 %2302, %v42_v3   ;;  %62 = vperm.xlu1 %2300, %v44_v5   ;;  %v844_v12 = vld [vmem:[%s3530_s6] sm:$0xff]  ;;  %v846_v14 = vld [vmem:[%s3530_s6 + $0x10] sm:$0xff]  ;;  %v418_v15 = vld [vmem:[%s3528_s4 + $0x18] sm:$0xff] }
   0xc   :  { %v1304_v16 = vld [vmem:[%s3532_s8] sm:$0xff]  ;;  %v845_v17 = vld [vmem:[%s3530_s6 + $0x8] sm:$0xff]  ;;  %v1306_v18 = vld [vmem:[%s3532_s8 + $0x10] sm:$0xff]  ;;  %3563 = vst [vmem:[#allocation5_spill] sm:$0xff] %v2715_v25  ;;  %v189_v26 = vsub.s32 1, %v2715_v25  ;;  %v197_v27 = vsub.s32 5, %v2715_v25 }
   0xd   :  { %v847_v19 = vld [vmem:[%s3530_s6 + $0x18] sm:$0xff]  ;;  %v1761_v20 = vld [vmem:[%s3534_s10] sm:$0x3]  ;;  %v1305_v21 = vld [vmem:[%s3532_s8 + $0x8] sm:$0xff]  ;;  %v69_v28 = vsub.s32 0, %v2715_v25  ;;  %v77_v29 = vsub.s32 4, %v2715_v25 }
   0xe   :  { %v1307_v22 = vld [vmem:[%s3532_s8 + $0x18] sm:$0xff]  ;;  %v40_v30 = vld [vmem:[%s3524_s0 + $0x8] sm:$0xff]  ;;  %v193_v31 = vsub.s32 3, %v2715_v25  ;;  %v201_v32 = vsub.s32 7, %v2715_v25  ;;  %v39_v33 = vld [vmem:[%s3524_s0] sm:$0xff]  ;;  %v73_v34 = vsub.s32 2, %v2715_v25 }
   0xf   :  { %57 = vperm.xlu0 %2302, %v43_v0   ;;  %2303 = vset.pattern.permute.xlu1 %v2585_v2  ;;  %v81_v35 = vsub.s32 6, %v2715_v25  ;;  %v206_v36 = vrot.slane %v40_v30, %v189_v26  ;;  %v214_v37 = vrot.slane %v40_v30, %v197_v27  ;;  %v86_v38 = vrot.slane %v40_v30, %v69_v28 }
  0x10   :  { %184 = vperm.xlu1 %2303, %v44_v5   ;;  %v94_v39 = vrot.slane %v40_v30, %v77_v29  ;;  %v194_v40 = vrot.slane %v39_v33, %v193_v31  ;;  %v202_v41 = vrot.slane %v39_v33, %v201_v32  ;;  %v190_v42 = vrot.slane %v39_v33, %v189_v26 }
  0x11   :  { %v198_v43 = vrot.slane %v39_v33, %v197_v27  ;;  %v74_v46 = vrot.slane %v39_v33, %v73_v34  ;;  %v82_v47 = vrot.slane %v39_v33, %v81_v35  ;;  %v70_v48 = vrot.slane %v39_v33, %v69_v28 }
  0x12   :  { %v78_v49 = vrot.slane %v39_v33, %v77_v29  ;;  %v90_v50 = vrot.slane %v40_v30, %v73_v34  ;;  %v210_v51 = vrot.slane %v40_v30, %v193_v31  ;;  %v98_v52 = vrot.slane %v40_v30, %v81_v35 }
  0x13   :  { %334 = vperm.xlu0 %2302, %v324_v6   ;;  %v218_v53 = vrot.slane %v40_v30, %v201_v32  ;;  %v2731_v54 = vrot.slane %v206_v36, %v189_v26  ;;  %v2733_v55 = vrot.slane %v214_v37, %v189_v26  ;;  %v2735_v56 = vrot.slane %v86_v38, %v69_v28 }
  0x14   :  { %2304 = vset.pattern.permute.xlu1 %v2586_v4  ;;  %v2737_v57 = vrot.slane %v94_v39, %v69_v28  ;;  %v2739_v58 = vrot.slane %v194_v40, %v189_v26  ;;  %v2741_v59 = vrot.slane %v202_v41, %v189_v26  ;;  %v2743_v60 = vrot.slane %v190_v42, %v189_v26 }
  0x15   :  { %329 = vperm.xlu1 %2304, %v323_v7   ;;  %v2745_v61 = vrot.slane %v198_v43, %v189_v26  ;;  %v114_v63 = vrot.slane %v74_v46, %v69_v28  ;;  %v2747_v0 = vrot.slane %v82_v47, %v69_v28  ;;  %v2749_v1 = vrot.slane %v70_v48, %v69_v28 }
  0x16   :  { %v2751_v2 = vrot.slane %v78_v49, %v69_v28  ;;  %v2753_v4 = vrot.slane %v90_v50, %v69_v28  ;;  %v2755_v5 = vrot.slane %v210_v51, %v189_v26  ;;  %v2757_v6 = vrot.slane %v98_v52, %v69_v28 }
  0x17   :  { %421 = vperm.xlu0 %2302, %v415_v8   ;;  %v2759_v7 = vrot.slane %v218_v53, %v189_v26 }
  0x19   :  { %339 = vperm.xlu1 %2304, %v325_v9  }
  0x1b   :  { %431 = vperm.xlu0 %2302, %v417_v10  }
  0x1d   :  { %344 = vperm.xlu1 %2304, %v326_v11  }
  0x1f   :  { %850 = vperm.xlu0 %2302, %v844_v12  }
  0x21   :  { %426 = vperm.xlu1 %2304, %v416_v13  }
  0x23   :  { %860 = vperm.xlu0 %2302, %v846_v14  }
  0x25   :  { %436 = vperm.xlu1 %2304, %v418_v15  }
  0x27   :  { %1310 = vperm.xlu0 %2302, %v1304_v16  }
  0x29   :  { %855 = vperm.xlu1 %2304, %v845_v17  }
  0x2b   :  { %1320 = vperm.xlu0 %2302, %v1306_v18  }
  0x2d   :  { %865 = vperm.xlu1 %2304, %v847_v19  }
  0x2f   :  { %1764 = vperm.xlu0 %2302, %v1761_v20  }
  0x31   :  { %1315 = vperm.xlu1 %2304, %v1305_v21  }
  0x35   :  { %1325 = vperm.xlu1 %2304, %v1307_v22  }
  0x81   :  { %v173_v44 = vpop.permute.xlu1 %172  ;;  %v181_v45 = vpop.permute.xlu0 %180 }
  0x82   :  { %v2762_v8 = vmul.f32 %v2731_v54, %v173_v44  ;;  %v2765_v9 = vmul.f32 %v2733_v55, %v173_v44  ;;  %v2768_v10 = vmul.f32 %v2731_v54, %v181_v45  ;;  %v2771_v11 = vmul.f32 %v2733_v55, %v181_v45 }
  0x83   :  { %v260_v12 = vmul.f32 %v2739_v58, %v173_v44  ;;  %v262_v13 = vmul.f32 %v2741_v59, %v173_v44  ;;  %v259_v14 = vmul.f32 %v2743_v60, %v173_v44  ;;  %v261_v15 = vmul.f32 %v2745_v61, %v173_v44 }
  0x84   :  { %3564 = vst [vmem:[#allocation6_spill] sm:$0xff] %v2768_v10  ;;  %3565 = vst [vmem:[#allocation7_spill] sm:$0xff] %v2771_v11  ;;  %v276_v16 = vmul.f32 %v2739_v58, %v181_v45  ;;  %v2779_v17 = vmul.f32 %v2741_v59, %v181_v45  ;;  %v2782_v18 = vmul.f32 %v2743_v60, %v181_v45 }
  0x85   :  { %v177_v62 = vpop.permute.xlu1 %176  ;;  %v2785_v19 = vmul.f32 %v2745_v61, %v181_v45  ;;  %v2793_v26 = vmul.f32 %v2755_v5, %v173_v44  ;;  %v2796_v27 = vmul.f32 %v2759_v7, %v173_v44  ;;  %v2801_v30 = vmul.f32 %v2755_v5, %v181_v45 }
  0x86   :  { %v48_v3 = vpop.permute.xlu0 %47  ;;  %v2804_v31 = vmul.f32 %v2759_v7, %v181_v45  ;;  %v2807_v32 = vmul.f32 %v2731_v54, %v177_v62  ;;  %v2810_v33 = vmul.f32 %v2733_v55, %v177_v62  ;;  %v268_v34 = vmul.f32 %v2739_v58, %v177_v62 }
  0x87   :  { %v140_v22 = vmul.f32 %v114_v63, %v48_v3  ;;  %v142_v24 = vmul.f32 %v2747_v0, %v48_v3  ;;  %v139_v28 = vmul.f32 %v2749_v1, %v48_v3  ;;  %v141_v29 = vmul.f32 %v2751_v2, %v48_v3 }
  0x88   :  { %v270_v35 = vmul.f32 %v2741_v59, %v177_v62  ;;  %v2815_v36 = vmul.f32 %v2735_v56, %v48_v3  ;;  %v2818_v37 = vmul.f32 %v2737_v57, %v48_v3  ;;  %v267_v43 = vmul.f32 %v2743_v60, %v177_v62 }
  0x89   :  { %v292_v41 = vadd.f32 %v260_v12, %v140_v22  ;;  %v294_v42 = vadd.f32 %v262_v13, %v142_v24  ;;  %v269_v44 = vmul.f32 %v2745_v61, %v177_v62  ;;  %v291_v46 = vadd.f32 %v259_v14, %v139_v28 }
  0x8a   :  { %v2787_v20 = vpop.permute.xlu0 %52  ;;  %v2789_v21 = vpop.permute.xlu1 %62  ;;  %v293_v47 = vadd.f32 %v261_v15, %v141_v29  ;;  %v2830_v48 = vmul.f32 %v2753_v4, %v48_v3  ;;  %v2833_v49 = vmul.f32 %v2755_v5, %v177_v62  ;;  %v2840_v52 = vmul.f32 %v2757_v6, %v48_v3 }
  0x8b   :  { %v148_v38 = vmul.f32 %v114_v63, %v2787_v20  ;;  %v150_v39 = vmul.f32 %v2747_v0, %v2787_v20  ;;  %v147_v50 = vmul.f32 %v2749_v1, %v2787_v20  ;;  %v149_v51 = vmul.f32 %v2751_v2, %v2787_v20 }
  0x8c   :  { %v2843_v53 = vmul.f32 %v2759_v7, %v177_v62  ;;  %v2847_v12 = vmul.f32 %v2735_v56, %v2787_v20  ;;  %v2851_v13 = vmul.f32 %v2737_v57, %v2787_v20  ;;  %v2855_v22 = vmul.f32 %v2735_v56, %v2789_v21 }
  0x8d   :  { %v300_v14 = vadd.f32 %v268_v34, %v148_v38  ;;  %v302_v15 = vadd.f32 %v270_v35, %v150_v39  ;;  %v164_v62 = vmul.f32 %v114_v63, %v2789_v21  ;;  %v166_v28 = vmul.f32 %v2747_v0, %v2789_v21 }
  0x8e   :  { %v2823_v40 = vpop.permute.xlu0 %57  ;;  %3566 = vst [vmem:[#allocation8_spill] sm:$0xff] %v2855_v22  ;;  %v163_v35 = vmul.f32 %v2749_v1, %v2789_v21  ;;  %v299_v39 = vadd.f32 %v267_v43, %v147_v50  ;;  %v301_v25 = vadd.f32 %v269_v44, %v149_v51  ;;  %v165_v11 = vmul.f32 %v2751_v2, %v2789_v21 }
  0x8f   :  { %v2827_v45 = vpop.permute.xlu1 %184  ;;  %v156_v3 = vmul.f32 %v114_v63, %v2823_v40  ;;  %v158_v34 = vmul.f32 %v2747_v0, %v2823_v40 }
  0x90   :  { %v284_v63 = vmul.f32 %v2739_v58, %v2827_v45  ;;  %v286_v43 = vmul.f32 %v2741_v59, %v2827_v45  ;;  %v2894_v59 = vmul.f32 %v2735_v56, %v2823_v40  ;;  %v152_v56 = vmul.f32 %v2753_v4, %v2787_v20 }
  0x91   :  { %v308_v10 = vadd.f32 %v276_v16, %v156_v3  ;;  %v310_v44 = vadd.f32 %v2779_v17, %v158_v34  ;;  %v157_v16 = vmul.f32 %v2751_v2, %v2823_v40  ;;  %v2898_v17 = vmul.f32 %v2737_v57, %v2823_v40 }
  0x92   :  { %v2857_v24 = vpop.permute.xlu0 %334  ;;  %v318_v2 = vadd.f32 %v286_v43, %v166_v28  ;;  %v2909_v51 = vmul.f32 %v2731_v54, %v2827_v45  ;;  %v154_v54 = vmul.f32 %v2757_v6, %v2787_v20  ;;  %v295_v20 = vadd.f32 %v2762_v8, %v2815_v36 }
  0x93   :  { %v356_v29 = vadd.f32 %v2857_v24, %v300_v14  ;;  %v358_v23 = vadd.f32 %v2857_v24, %v302_v15  ;;  %v355_v22 = vadd.f32 %v2857_v24, %v299_v39  ;;  %v304_v39 = vadd.f32 %v2833_v49, %v152_v56 }
  0x94   :  { %v2869_v38 = vpop.permute.xlu1 %329  ;;  %v289_v56 = vmul.f32 %v2733_v55, %v2827_v45 }
  0x95   :  { %v348_v14 = vadd.f32 %v2869_v38, %v292_v41  ;;  %2305 = vtanh.f32 %v356_v29  ;;  %v350_v15 = vadd.f32 %v2869_v38, %v294_v42  ;;  %v347_v0 = vadd.f32 %v2869_v38, %v291_v46 }
  0x96   :  { %2307 = vtanh.f32 %v358_v23  ;;  %v349_v58 = vadd.f32 %v2869_v38, %v293_v47  ;;  %v155_v41 = vmul.f32 %v2749_v1, %v2823_v40  ;;  %v357_v42 = vadd.f32 %v2857_v24, %v301_v25 }
  0x97   :  { %2309 = vtanh.f32 %v348_v14  ;;  %v283_v23 = vmul.f32 %v2743_v60, %v2827_v45  ;;  %v316_v46 = vadd.f32 %v284_v63, %v164_v62  ;;  %v285_v60 = vmul.f32 %v2745_v61, %v2827_v45 }
  0x98   :  { %v2885_v50 = vpop.permute.xlu1 %339  ;;  %2311 = vtanh.f32 %v350_v15  ;;  %v307_v47 = vadd.f32 %v2782_v18, %v155_v41  ;;  %v288_v41 = vmul.f32 %v2755_v5, %v2827_v45  ;;  %v168_v5 = vmul.f32 %v2753_v4, %v2789_v21 }
  0x99   :  { %2313 = vtanh.f32 %v347_v0  ;;  %v364_v1 = vadd.f32 %v2885_v50, %v308_v10  ;;  %v366_v25 = vadd.f32 %v2885_v50, %v310_v44  ;;  %v315_v10 = vadd.f32 %v283_v23, %v163_v35 }
  0x9a   :  { %2315 = vtanh.f32 %v355_v22  ;;  %v309_v22 = vadd.f32 %v2785_v19, %v157_v16  ;;  %v363_v18 = vadd.f32 %v2885_v50, %v307_v47  ;;  %v317_v29 = vadd.f32 %v285_v60, %v165_v11 }
  0x9b   :  { %2317 = vtanh.f32 %v349_v58  ;;  %v296_v19 = vadd.f32 %v2793_v26, %v2830_v48  ;;  %v298_v11 = vadd.f32 %v2796_v27, %v2840_v52  ;;  %v360_v26 = vadd.f32 %v2857_v24, %v304_v39 }
  0x9c   :  { %v2911_v3 = vpop.permute.xlu1 %344  ;;  %2319 = vtanh.f32 %v357_v42  ;;  %v365_v35 = vadd.f32 %v2885_v50, %v309_v22  ;;  %v303_v48 = vadd.f32 %v2807_v32, %v2847_v12  ;;  %v306_v27 = vadd.f32 %v2843_v53, %v154_v54  ;;  %v3568_v54 = vld [vmem:[#allocation8_spill] sm:$0xff] }
  0x9d   :  { %v372_v62 = vadd.f32 %v2911_v3, %v316_v46  ;;  %2321 = vtanh.f32 %v364_v1  ;;  %v374_v61 = vadd.f32 %v2911_v3, %v318_v2  ;;  %v371_v28 = vadd.f32 %v2911_v3, %v315_v10 }
  0x9e   :  { %2323 = vtanh.f32 %v366_v25  ;;  %v373_v14 = vadd.f32 %v2911_v3, %v317_v29  ;;  %v352_v0 = vadd.f32 %v2869_v38, %v296_v19  ;;  %v354_v8 = vadd.f32 %v2869_v38, %v298_v11 }
  0x9f   :  { %v2920_v34 = vpop.eup %2305  ;;  %2325 = vtanh.f32 %v372_v62  ;;  %v351_v58 = vadd.f32 %v2869_v38, %v295_v20  ;;  %v160_v32 = vmul.f32 %v2753_v4, %v2823_v40  ;;  %v362_v44 = vadd.f32 %v2857_v24, %v306_v27 }
  0xa0   :  { %v2926_v63 = vpop.eup %2307  ;;  %2327 = vtanh.f32 %v374_v61  ;;  %v359_v53 = vadd.f32 %v2857_v24, %v303_v48  ;;  %v297_v16 = vadd.f32 %v2765_v9, %v2818_v37  ;;  %v162_v1 = vmul.f32 %v2757_v6, %v2823_v40  ;;  %v3567_v61 = vld [vmem:[#allocation6_spill] sm:$0xff] }
  0xa1   :  { %v2933_v15 = vpop.eup %2309  ;;  %2329 = vtanh.f32 %v363_v18  ;;  %v305_v25 = vadd.f32 %v2810_v33, %v2851_v13  ;;  %v290_v60 = vmul.f32 %v2759_v7, %v2827_v45  ;;  %v312_v40 = vadd.f32 %v2801_v30, %v160_v32  ;;  %v412_v32 = vld [vmem:[%s3527_s3 + $0x8] sm:$0xff] }
  0xa2   :  { %v2939_v49 = vpop.eup %2311  ;;  %v2166_v43 = vpack.c.bf16 %v2920_v34, %v2933_v15  ;;  %2331 = vtanh.f32 %v371_v28  ;;  %v353_v37 = vadd.f32 %v2869_v38, %v297_v16  ;;  %v320_v4 = vadd.f32 %v288_v41, %v168_v5 }
  0xa3   :  { %v2945_v36 = vpop.eup %2313  ;;  %v2174_v52 = vpack.c.bf16 %v2926_v63, %v2939_v49  ;;  %2333 = vtanh.f32 %v365_v35  ;;  %v361_v33 = vadd.f32 %v2857_v24, %v305_v25  ;;  %v170_v7 = vmul.f32 %v2757_v6, %v2789_v21  ;;  %v413_v25 = vld [vmem:[%s3527_s3 + $0x10] sm:$0xff] }
  0xa4   :  { %v2952_v12 = vpop.eup %2315  ;;  %2167 = vmatprep.subr.bf16.mxu0 %v2166_v43  ;;  %2335 = vtanh.f32 %v373_v14  ;;  %v368_v38 = vadd.f32 %v2885_v50, %v312_v40  ;;  %v314_v30 = vadd.f32 %v2804_v31, %v162_v1  ;;  %v376_v22 = vadd.f32 %v2911_v3, %v320_v4  ;;  %v3569_v14 = vld [vmem:[#allocation7_spill] sm:$0xff]  ;;  %v414_v4 = vld [vmem:[%s3527_s3 + $0x18] sm:$0xff] }
  0xa5   :  { %v2958_v42 = vpop.eup %2317  ;;  %2175 = vmatprep.subr.bf16.mxu1 %v2174_v52  ;;  %v2168_v23 = vpack.c.bf16 %v2952_v12, %v2945_v36  ;;  %2337 = vtanh.f32 %v352_v0  ;;  %v322_v6 = vadd.f32 %v290_v60, %v170_v7  ;;  %v311_v31 = vadd.f32 %v3567_v61, %v2894_v59 }
  0xa6   :  { %v2966_v46 = vpop.eup %2319  ;;  %2339 = vtanh.f32 %v360_v26  ;;  %v370_v45 = vadd.f32 %v2885_v50, %v314_v30  ;;  %v169_v28 = vmul.f32 %v2737_v57, %v2789_v21  ;;  %v319_v35 = vadd.f32 %v2909_v51, %v3568_v54  ;;  %v3027_v26 = vld [vmem:[%s3527_s3] sm:$0xff] }
  0xa7   :  { %v2974_v2 = vpop.eup %2321  ;;  %2169 = vmatpush1.bf16.msra.mxu0 %v2168_v23  ;;  %v2176_v9 = vpack.c.bf16 %v2966_v46, %v2958_v42  ;;  %2341 = vtanh.f32 %v354_v8  ;;  %v378_v29 = vadd.f32 %v2911_v3, %v322_v6  ;;  %v367_v59 = vadd.f32 %v2885_v50, %v311_v31 }
  0xa8   :  { %v2980_v47 = vpop.eup %2323  ;;  %2343 = vtanh.f32 %v362_v44  ;;  %v313_v11 = vadd.f32 %v3569_v14, %v2898_v17  ;;  %v375_v21 = vadd.f32 %v2911_v3, %v319_v35  ;;  %v321_v20 = vadd.f32 %v289_v56, %v169_v28 }
  0xa9   :  { %v2985_v13 = vpop.eup %2325  ;;  %2177 = vmatpush1.bf16.msra.mxu1 %v2176_v9  ;;  %2345 = vtanh.f32 %v351_v58 }
  0xaa   :  { %v2991_v10 = vpop.eup %2327  ;;  %v2170_v24 = vpack.c.bf16 %v2985_v13, %v2974_v2  ;;  %2347 = vtanh.f32 %v359_v53  ;;  %v369_v17 = vadd.f32 %v2885_v50, %v313_v11  ;;  %v377_v43 = vadd.f32 %v2911_v3, %v321_v20 }
  0xab   :  { %v2996_v62 = vpop.eup %2329  ;;  %v2178_v55 = vpack.c.bf16 %v2991_v10, %v2980_v47  ;;  %2349 = vtanh.f32 %v353_v37  ;;  %v3570_v3 = vmov 0.0  }
  0xac   :  { %v3003_v18 = vpop.eup %2331  ;;  %2171 = vmatprep.subr.bf16.mxu0 %v2170_v24  ;;  %2351 = vtanh.f32 %v361_v33 }
  0xad   :  { %v3010_v19 = vpop.eup %2333  ;;  %2179 = vmatprep.subr.bf16.mxu1 %v2178_v55  ;;  %v2172_v39 = vpack.c.bf16 %v3003_v18, %v2996_v62  ;;  %2353 = vtanh.f32 %v368_v38 }
  0xae   :  { %v3017_v57 = vpop.eup %2335  ;;  %2355 = vtanh.f32 %v376_v22  ;;  %v3122_v22 = vpop.permute.xlu0 %421 }
  0xaf   :  { %v3020_v0 = vpop.eup %2337  ;;  %2173 = vmatpush1.bf16.msra.mxu0 %v2172_v39  ;;  %v2180_v51 = vpack.c.bf16 %v3017_v57, %v3010_v19  ;;  %2357 = vtanh.f32 %v370_v45 }
  0xb0   :  { %v3030_v48 = vpop.eup %2339  ;;  %2359 = vtanh.f32 %v378_v29  ;;  %v3126_v29 = vpop.permute.xlu1 %426 }
  0xb1   :  { %v3033_v27 = vpop.eup %2341  ;;  %2181 = vmatpush1.bf16.msra.mxu1 %v2180_v51  ;;  %v2182_v8 = vpack.c.bf16 %v3030_v48, %v3020_v0  ;;  %2361 = vtanh.f32 %v367_v59 }
  0xb2   :  { %v3037_v52 = vpop.eup %2343  ;;  %2114 = vmatmul.mubr.msk.f32.vlgmr.msra.gmra.mrb[0].mxu0 %vm439_vm0, %v3027_v26  ;;  %2363 = vtanh.f32 %v375_v21 }
  0xb3   :  { %v3041_v58 = vpop.eup %2345  ;;  %2183 = vmatprep.subr.bf16.mxu0 %v2182_v8  ;;  %v2190_v50 = vpack.c.bf16 %v3037_v52, %v3033_v27  ;;  %522 = vmatprep.mubr.f32.mxu0 %v3570_v3  ;;  %2365 = vtanh.f32 %v369_v17 }
  0xb4   :  { %v3049_v44 = vpop.eup %2347  ;;  %2118 = vmatmul.mubr.msk.f32.vlgmr.msra.gmra.mrb[0].mxu1 %vm439_vm0, %v3027_v26  ;;  %2367 = vtanh.f32 %v377_v43 }
  0xb5   :  { %v3053_v53 = vpop.eup %2349  ;;  %2191 = vmatprep.subr.bf16.mxu1 %v2190_v50  ;;  %v2184_v41 = vpack.c.bf16 %v3049_v44, %v3041_v58  ;;  %611 = vmatprep.mubr.f32.mxu1 %v3570_v3 }
  0xb6   :  { %v3058_v23 = vpop.eup %2351  ;;  %2115 = vmatmul.mubr.msk.f32.gmra.mrb[2].mxu0 %vm439_vm0, %v412_v32 }
  0xb7   :  { %v3061_v16 = vpop.eup %2353  ;;  %2185 = vmatpush1.bf16.msra.mxu0 %v2184_v41  ;;  %v2192_v1 = vpack.c.bf16 %v3058_v23, %v3053_v53  ;;  %528 = vmatprep.mubr.f32.mxu0 %v3570_v3 }
  0xb8   :  { %v3069_v5 = vpop.eup %2355  ;;  %2119 = vmatmul.mubr.msk.f32.gmra.mrb[2].mxu1 %vm439_vm0, %v412_v32 }
  0xb9   :  { %v3072_v60 = vpop.eup %2357  ;;  %2193 = vmatpush1.bf16.msra.mxu1 %v2192_v1  ;;  %v2186_v9 = vpack.c.bf16 %v3069_v5, %v3061_v16  ;;  %617 = vmatprep.mubr.f32.mxu1 %v3570_v3 }
  0xba   :  { %v3077_v37 = vpop.eup %2359  ;;  %2116 = vmatmul.mubr.msk.f32.gmra.mrb[4].mxu0 %vm439_vm0, %v413_v25 }
  0xbb   :  { %v3080_v40 = vpop.eup %2361  ;;  %2187 = vmatprep.subr.bf16.mxu0 %v2186_v9  ;;  %v2194_v33 = vpack.c.bf16 %v3077_v37, %v3072_v60  ;;  %534 = vmatprep.mubr.f32.mxu0 %v3570_v3 }
  0xbc   :  { %v3088_v7 = vpop.eup %2363  ;;  %2120 = vmatmul.mubr.msk.f32.gmra.mrb[4].mxu1 %vm439_vm0, %v413_v25 }
  0xbd   :  { %v3091_v56 = vpop.eup %2365  ;;  %2195 = vmatprep.subr.bf16.mxu1 %v2194_v33  ;;  %v2188_v38 = vpack.c.bf16 %v3088_v7, %v3080_v40  ;;  %623 = vmatprep.mubr.f32.mxu1 %v3570_v3 }
  0xbe   :  { %v3096_v30 = vpop.eup %2367  ;;  %2117 = vmatmul.mubr.msk.f32.gmra.mrb[6].mxu0 %vm439_vm0, %v414_v4 }
  0xbf   :  { %2189 = vmatpush1.bf16.msra.mxu0 %v2188_v38  ;;  %v2196_v24 = vpack.c.bf16 %v3096_v30, %v3091_v56  ;;  %694 = vmatprep.mubr.f32.mxu0 %v3570_v3 }
  0xc0   :  { %2121 = vmatmul.mubr.msk.f32.gmra.mrb[6].mxu1 %vm439_vm0, %v414_v4 }
  0xc1   :  { %2197 = vmatpush1.bf16.msra.mxu1 %v2196_v24  ;;  %783 = vmatprep.mubr.f32.mxu1 %v3570_v3 }
  0xc2   :  { %2122 = vmatmul.mubr.msk.f32.vlgmr.msra.gmra.mrb[8].mxu0 %vm439_vm0, %v3027_v26 }
  0xc3   :  { %700 = vmatprep.mubr.f32.mxu0 %v3570_v3 }
  0xc4   :  { %2126 = vmatmul.mubr.msk.f32.vlgmr.msra.gmra.mrb[8].mxu1 %vm439_vm0, %v3027_v26  ;;  %v3133_v26 = vpop.permute.xlu0 %431 }
  0xc5   :  { %789 = vmatprep.mubr.f32.mxu1 %v3570_v3 }
  0xc6   :  { %2123 = vmatmul.mubr.msk.f32.gmra.mrb[10].mxu0 %vm439_vm0, %v412_v32 }
  0xc7   :  { %706 = vmatprep.mubr.f32.mxu0 %v3570_v3 }
  0xc8   :  { %2127 = vmatmul.mubr.msk.f32.gmra.mrb[10].mxu1 %vm439_vm0, %v412_v32 }
  0xc9   :  { %795 = vmatprep.mubr.f32.mxu1 %v3570_v3 }
  0xca   :  { %2124 = vmatmul.mubr.msk.f32.gmra.mrb[12].mxu0 %vm439_vm0, %v413_v25 }
  0xcb   :  { %712 = vmatprep.mubr.f32.mxu0 %v3570_v3 }
  0xcc   :  { %2128 = vmatmul.mubr.msk.f32.gmra.mrb[12].mxu1 %vm439_vm0, %v413_v25  ;;  %v3138_v25 = vpop.permute.xlu1 %436 }
  0xcd   :  { %801 = vmatprep.mubr.f32.mxu1 %v3570_v3 }
  0xce   :  { %2125 = vmatmul.mubr.msk.f32.gmra.mrb[14].mxu0 %vm439_vm0, %v414_v4 }
  0xcf   :  { %944 = vmatprep.mubr.f32.mxu0 %v3570_v3 }
  0xd0   :  { %2129 = vmatmul.mubr.msk.f32.gmra.mrb[14].mxu1 %vm439_vm0, %v414_v4 }
  0xd1   :  { %1033 = vmatprep.mubr.f32.mxu1 %v3570_v3 }
 0x185   :  { %v518_v6 = vpop.f32.mrb[0].mxu0 }
 0x186   :  { %v519_v55 = vadd.f32 %v518_v6, %v3122_v22  ;;  %v520_v45 = vpop.f32.mrb[1].mxu0 }
 0x187   :  { %v607_v61 = vpop.f32.mrb[0].mxu1  ;;  %v521_v31 = vadd.f32 %v520_v45, %v3122_v22 }
 0x188   :  { %v609_v28 = vpop.f32.mrb[1].mxu1  ;;  %2369 = vtanh.f32 %v519_v55  ;;  %v608_v21 = vadd.f32 %v607_v61, %v3122_v22 }
 0x189   :  { %v610_v54 = vadd.f32 %v609_v28, %v3122_v22  ;;  %v524_v35 = vpop.f32.mrb[2].mxu0  ;;  %2371 = vtanh.f32 %v521_v31 }
 0x18a   :  { %v525_v39 = vadd.f32 %v524_v35, %v3126_v29  ;;  %v526_v59 = vpop.f32.mrb[3].mxu0 }
 0x18b   :  { %2373 = vtanh.f32 %v610_v54  ;;  %v613_v14 = vpop.f32.mrb[2].mxu1  ;;  %v527_v11 = vadd.f32 %v526_v59, %v3126_v29 }
 0x18c   :  { %2375 = vtanh.f32 %v525_v39  ;;  %v614_v20 = vadd.f32 %v613_v14, %v3126_v29  ;;  %v615_v51 = vpop.f32.mrb[3].mxu1 }
 0x18d   :  { %2377 = vtanh.f32 %v527_v11  ;;  %v616_v17 = vadd.f32 %v615_v51, %v3126_v29  ;;  %v530_v43 = vpop.f32.mrb[4].mxu0 }
 0x18e   :  { %2379 = vtanh.f32 %v614_v20  ;;  %v531_v8 = vadd.f32 %v530_v43, %v3133_v26  ;;  %v532_v50 = vpop.f32.mrb[5].mxu0 }
 0x18f   :  { %2381 = vtanh.f32 %v616_v17  ;;  %v619_v32 = vpop.f32.mrb[4].mxu1  ;;  %v533_v41 = vadd.f32 %v532_v50, %v3133_v26 }
 0x190   :  { %2383 = vtanh.f32 %v608_v21  ;;  %v621_v1 = vpop.f32.mrb[5].mxu1  ;;  %v620_v61 = vadd.f32 %v619_v32, %v3133_v26 }
 0x191   :  { %2385 = vtanh.f32 %v531_v8  ;;  %v622_v9 = vadd.f32 %v621_v1, %v3133_v26  ;;  %v536_v33 = vpop.f32.mrb[6].mxu0 }
 0x192   :  { %2387 = vtanh.f32 %v533_v41  ;;  %v537_v4 = vadd.f32 %v536_v33, %v3138_v25  ;;  %v538_v38 = vpop.f32.mrb[7].mxu0  ;;  %v3142_v24 = vpop.eup %2369 }
 0x193   :  { %2389 = vtanh.f32 %v622_v9  ;;  %v625_v6 = vpop.f32.mrb[6].mxu1  ;;  %v539_v55 = vadd.f32 %v538_v38, %v3138_v25  ;;  %v3145_v45 = vpop.eup %2371 }
 0x194   :  { %2391 = vtanh.f32 %v537_v4  ;;  %v626_v31 = vadd.f32 %v625_v6, %v3138_v25  ;;  %v627_v28 = vpop.f32.mrb[7].mxu1 }
 0x195   :  { %v3149_v54 = vpop.eup %2373  ;;  %2393 = vtanh.f32 %v539_v55  ;;  %v628_v35 = vadd.f32 %v627_v28, %v3138_v25  ;;  %v696_v39 = vpop.f32.mrb[8].mxu0 }
 0x196   :  { %v3152_v59 = vpop.eup %2375  ;;  %2395 = vtanh.f32 %v626_v31  ;;  %v697_v14 = vadd.f32 %v696_v39, %v3122_v22  ;;  %v698_v11 = vpop.f32.mrb[9].mxu0 }
 0x197   :  { %v3155_v21 = vpop.eup %2377  ;;  %2397 = vtanh.f32 %v628_v35  ;;  %v785_v20 = vpop.f32.mrb[8].mxu1  ;;  %v699_v51 = vadd.f32 %v698_v11, %v3122_v22  ;;  %v2200_v1 = vpack.c.bf16 %v3152_v59, %v3142_v24 }
 0x198   :  { %v3158_v17 = vpop.eup %2379  ;;  %2399 = vtanh.f32 %v620_v61  ;;  %v787_v43 = vpop.f32.mrb[9].mxu1  ;;  %v2198_v8 = vpack.c.bf16 %v3155_v21, %v3145_v45  ;;  %v786_v35 = vadd.f32 %v785_v20, %v3122_v22 }
 0x199   :  { %v3162_v50 = vpop.eup %2381  ;;  %2401 = vtanh.f32 %v697_v14  ;;  %v788_v32 = vadd.f32 %v787_v43, %v3122_v22  ;;  %v702_v41 = vpop.f32.mrb[10].mxu0 }
 0x19a   :  { %v3167_v9 = vpop.eup %2383  ;;  %2403 = vtanh.f32 %v699_v51  ;;  %v703_v33 = vadd.f32 %v702_v41, %v3126_v29  ;;  %v704_v4 = vpop.f32.mrb[11].mxu0  ;;  %2199 = vmatprep.subr.bf16.mxu0 %v2198_v8  ;;  %v2206_v38 = vpack.c.bf16 %v3162_v50, %v3149_v54 }
 0x19b   :  { %v3172_v6 = vpop.eup %2385  ;;  %2405 = vtanh.f32 %v788_v32  ;;  %v791_v55 = vpop.f32.mrb[10].mxu1  ;;  %v705_v61 = vadd.f32 %v704_v4, %v3126_v29  ;;  %2201 = vmatpush1.bf16.msra.mxu0 %v2200_v1  ;;  %v2208_v31 = vpack.c.bf16 %v3158_v17, %v3167_v9 }
 0x19c   :  { %3571 = vst [vmem:[#allocation6_spill] sm:$0xff] %v3172_v6  ;;  %v3177_v28 = vpop.eup %2387  ;;  %2407 = vtanh.f32 %v703_v33  ;;  %v792_v39 = vadd.f32 %v791_v55, %v3126_v29  ;;  %v793_v14 = vpop.f32.mrb[11].mxu1  ;;  %2207 = vmatprep.subr.bf16.mxu1 %v2206_v38 }
 0x19d   :  { %3572 = vst [vmem:[#allocation8_spill] sm:$0xff] %v3177_v28  ;;  %v3181_v11 = vpop.eup %2389  ;;  %2409 = vtanh.f32 %v705_v61  ;;  %v794_v51 = vadd.f32 %v793_v14, %v3126_v29  ;;  %2209 = vmatpush1.bf16.msra.mxu1 %v2208_v31  ;;  %v708_v43 = vpop.f32.mrb[12].mxu0 }
 0x19e   :  { %3573 = vst [vmem:[#allocation7_spill] sm:$0xff] %v3181_v11  ;;  %v3184_v8 = vpop.eup %2391  ;;  %2411 = vtanh.f32 %v792_v39  ;;  %v709_v32 = vadd.f32 %v708_v43, %v3133_v26  ;;  %v710_v41 = vpop.f32.mrb[13].mxu0 }
 0x19f   :  { %3574 = vst [vmem:[#allocation9_spill] sm:$0xff] %v3184_v8  ;;  %v3187_v1 = vpop.eup %2393  ;;  %2413 = vtanh.f32 %v794_v51  ;;  %v797_v22 = vpop.f32.mrb[12].mxu1  ;;  %v711_v20 = vadd.f32 %v710_v41, %v3133_v26  ;;  %v2204_v31 = vpack.c.bf16 %v3184_v8, %v3172_v6 }
 0x1a0   :  { %3575 = vst [vmem:[#allocation10_spill] sm:$0xff] %v3187_v1  ;;  %v3190_v33 = vpop.eup %2395  ;;  %2415 = vtanh.f32 %v786_v35  ;;  %v799_v4 = vpop.f32.mrb[13].mxu1  ;;  %v2202_v29 = vpack.c.bf16 %v3187_v1, %v3177_v28 }
 0x1a1   :  { %3576 = vst [vmem:[#allocation11_spill] sm:$0xff] %v3190_v33  ;;  %v3194_v38 = vpop.eup %2397  ;;  %2417 = vtanh.f32 %v709_v32  ;;  %v800_v55 = vadd.f32 %v799_v4, %v3133_v26  ;;  %v714_v61 = vpop.f32.mrb[14].mxu0 }
 0x1a2   :  { %3577 = vst [vmem:[#allocation12_spill] sm:$0xff] %v3194_v38  ;;  %v3199_v39 = vpop.eup %2399  ;;  %2419 = vtanh.f32 %v711_v20  ;;  %v715_v14 = vadd.f32 %v714_v61, %v3138_v25  ;;  %v716_v51 = vpop.f32.mrb[15].mxu0  ;;  %2203 = vmatprep.subr.bf16.mxu0 %v2202_v29  ;;  %v2210_v35 = vpack.c.bf16 %v3194_v38, %v3181_v11  ;;  %v3212_v20 = vld [vmem:[%s3529_s5] sm:$0xff]  ;;  %v798_v29 = vadd.f32 %v797_v22, %v3133_v26  ;;  %v841_v26 = vld [vmem:[%s3529_s5 + $0x8] sm:$0xff] }
 0x1a3   :  { %3578 = vst [vmem:[#allocation13_spill] sm:$0xff] %v3199_v39  ;;  %v3204_v43 = vpop.eup %2401  ;;  %2421 = vtanh.f32 %v800_v55  ;;  %v803_v32 = vpop.f32.mrb[14].mxu1  ;;  %v717_v41 = vadd.f32 %v716_v51, %v3138_v25  ;;  %2205 = vmatpush1.bf16.msra.mxu0 %v2204_v31  ;;  %v2212_v4 = vpack.c.bf16 %v3190_v33, %v3199_v39 }
 0x1a4   :  { %3579 = vst [vmem:[#allocation14_spill] sm:$0xff] %v3204_v43  ;;  %v3214_v61 = vpop.eup %2403  ;;  %2423 = vtanh.f32 %v715_v14  ;;  %v804_v38 = vadd.f32 %v803_v32, %v3138_v25  ;;  %v805_v55 = vpop.f32.mrb[15].mxu1  ;;  %2211 = vmatprep.subr.bf16.mxu1 %v2210_v35 }
 0x1a5   :  { %3580 = vst [vmem:[#allocation15_spill] sm:$0xff] %v3214_v61  ;;  %v3218_v11 = vpop.eup %2405  ;;  %2425 = vtanh.f32 %v717_v41  ;;  %v806_v31 = vadd.f32 %v805_v55, %v3138_v25  ;;  %2213 = vmatpush1.bf16.msra.mxu1 %v2212_v4 }
 0x1a6   :  { %3581 = vst [vmem:[#allocation16_spill] sm:$0xff] %v3218_v11  ;;  %v3221_v51 = vpop.eup %2407  ;;  %2427 = vtanh.f32 %v804_v38  ;;  %2130 = vmatmul.mubr.msk.f32.vlgmr.msra.gmra.mrb[16].mxu0 %vm439_vm0, %v3212_v20 }
 0x1a7   :  { %3582 = vst [vmem:[#allocation17_spill] sm:$0xff] %v3221_v51  ;;  %v3225_v33 = vpop.eup %2409  ;;  %2429 = vtanh.f32 %v806_v31  ;;  %950 = vmatprep.mubr.f32.mxu0 %v3570_v3  ;;  %v2216_v14 = vpack.c.bf16 %v3221_v51, %v3204_v43 }
 0x1a8   :  { %3583 = vst [vmem:[#allocation18_spill] sm:$0xff] %v3225_v33  ;;  %v3231_v22 = vpop.eup %2411  ;;  %2431 = vtanh.f32 %v798_v29  ;;  %2134 = vmatmul.mubr.msk.f32.vlgmr.msra.gmra.mrb[16].mxu1 %vm439_vm0, %v3212_v20  ;;  %v2214_v25 = vpack.c.bf16 %v3225_v33, %v3214_v61  ;;  %v842_v29 = vld [vmem:[%s3529_s5 + $0x10] sm:$0xff] }
 0x1a9   :  { %3584 = vst [vmem:[#allocation19_spill] sm:$0xff] %v3231_v22  ;;  %v3237_v38 = vpop.eup %2413  ;;  %1039 = vmatprep.mubr.f32.mxu1 %v3570_v3 }
 0x1aa   :  { %3585 = vst [vmem:[#allocation20_spill] sm:$0xff] %v3237_v38  ;;  %v3242_v35 = vpop.eup %2415  ;;  %2131 = vmatmul.mubr.msk.f32.gmra.mrb[18].mxu0 %vm439_vm0, %v841_v26  ;;  %2215 = vmatprep.subr.bf16.mxu0 %v2214_v25  ;;  %v2222_v32 = vpack.c.bf16 %v3237_v38, %v3218_v11  ;;  %v843_v38 = vld [vmem:[%s3529_s5 + $0x18] sm:$0xff] }
 0x1ab   :  { %3586 = vst [vmem:[#allocation21_spill] sm:$0xff] %v3242_v35  ;;  %v3247_v41 = vpop.eup %2417  ;;  %2217 = vmatpush1.bf16.msra.mxu0 %v2216_v14  ;;  %v2224_v4 = vpack.c.bf16 %v3231_v22, %v3242_v35  ;;  %956 = vmatprep.mubr.f32.mxu0 %v3570_v3 }
 0x1ac   :  { %3587 = vst [vmem:[#allocation22_spill] sm:$0xff] %v3247_v41  ;;  %v3255_v55 = vpop.eup %2419  ;;  %2135 = vmatmul.mubr.msk.f32.gmra.mrb[18].mxu1 %vm439_vm0, %v841_v26  ;;  %2223 = vmatprep.subr.bf16.mxu1 %v2222_v32 }
 0x1ad   :  { %3588 = vst [vmem:[#allocation23_spill] sm:$0xff] %v3255_v55  ;;  %v3258_v31 = vpop.eup %2421  ;;  %2225 = vmatpush1.bf16.msra.mxu1 %v2224_v4  ;;  %1045 = vmatprep.mubr.f32.mxu1 %v3570_v3 }
 0x1ae   :  { %3589 = vst [vmem:[#allocation24_spill] sm:$0xff] %v3258_v31  ;;  %v3261_v25 = vpop.eup %2423  ;;  %2132 = vmatmul.mubr.msk.f32.gmra.mrb[20].mxu0 %vm439_vm0, %v842_v29 }
 0x1af   :  { %3590 = vst [vmem:[#allocation25_spill] sm:$0xff] %v3261_v25  ;;  %v3264_v14 = vpop.eup %2425  ;;  %962 = vmatprep.mubr.f32.mxu0 %v3570_v3  ;;  %v2220_v22 = vpack.c.bf16 %v3261_v25, %v3247_v41 }
 0x1b0   :  { %3591 = vst [vmem:[#allocation26_spill] sm:$0xff] %v3264_v14  ;;  %v3270_v11 = vpop.eup %2427  ;;  %2136 = vmatmul.mubr.msk.f32.gmra.mrb[20].mxu1 %vm439_vm0, %v842_v29  ;;  %v2218_v32 = vpack.c.bf16 %v3264_v14, %v3255_v55 }
 0x1b1   :  { %3592 = vst [vmem:[#allocation27_spill] sm:$0xff] %v3270_v11  ;;  %v3275_v4 = vpop.eup %2429  ;;  %1051 = vmatprep.mubr.f32.mxu1 %v3570_v3 }
 0x1b2   :  { %3593 = vst [vmem:[#allocation28_spill] sm:$0xff] %v3275_v4  ;;  %v3280_v35 = vpop.eup %2431  ;;  %2133 = vmatmul.mubr.msk.f32.gmra.mrb[22].mxu0 %vm439_vm0, %v843_v38  ;;  %2219 = vmatprep.subr.bf16.mxu0 %v2218_v32  ;;  %v2226_v33 = vpack.c.bf16 %v3275_v4, %v3258_v31  ;;  %v3313_v31 = vpop.permute.xlu1 %855 }
 0x1b3   :  { %3594 = vst [vmem:[#allocation29_spill] sm:$0xff] %v3280_v35  ;;  %2221 = vmatpush1.bf16.msra.mxu0 %v2220_v22  ;;  %v2228_v61 = vpack.c.bf16 %v3270_v11, %v3280_v35  ;;  %1122 = vmatprep.mubr.f32.mxu0 %v3570_v3 }
 0x1b4   :  { %2137 = vmatmul.mubr.msk.f32.gmra.mrb[22].mxu1 %vm439_vm0, %v843_v38  ;;  %2227 = vmatprep.subr.bf16.mxu1 %v2226_v33  ;;  %v3308_v33 = vpop.permute.xlu0 %850 }
 0x1b5   :  { %2229 = vmatpush1.bf16.msra.mxu1 %v2228_v61  ;;  %1211 = vmatprep.mubr.f32.mxu1 %v3570_v3 }
 0x1b6   :  { %2138 = vmatmul.mubr.msk.f32.vlgmr.msra.gmra.mrb[24].mxu0 %vm439_vm0, %v3212_v20 }
 0x1b7   :  { %1128 = vmatprep.mubr.f32.mxu0 %v3570_v3 }
 0x1b8   :  { %2142 = vmatmul.mubr.msk.f32.vlgmr.msra.gmra.mrb[24].mxu1 %vm439_vm0, %v3212_v20 }
 0x1b9   :  { %1217 = vmatprep.mubr.f32.mxu1 %v3570_v3 }
 0x1ba   :  { %2139 = vmatmul.mubr.msk.f32.gmra.mrb[26].mxu0 %vm439_vm0, %v841_v26 }
 0x1bb   :  { %1134 = vmatprep.mubr.f32.mxu0 %v3570_v3 }
 0x1bc   :  { %2143 = vmatmul.mubr.msk.f32.gmra.mrb[26].mxu1 %vm439_vm0, %v841_v26 }
 0x1bd   :  { %1223 = vmatprep.mubr.f32.mxu1 %v3570_v3 }
 0x1be   :  { %2140 = vmatmul.mubr.msk.f32.gmra.mrb[28].mxu0 %vm439_vm0, %v842_v29 }
 0x1bf   :  { %1140 = vmatprep.mubr.f32.mxu0 %v3570_v3 }
 0x1c0   :  { %2144 = vmatmul.mubr.msk.f32.gmra.mrb[28].mxu1 %vm439_vm0, %v842_v29 }
 0x1c1   :  { %1229 = vmatprep.mubr.f32.mxu1 %v3570_v3 }
 0x1c2   :  { %2141 = vmatmul.mubr.msk.f32.gmra.mrb[30].mxu0 %vm439_vm0, %v843_v38 }
 0x1c3   :  { %1404 = vmatprep.mubr.f32.mxu0 %v3570_v3 }
 0x1c4   :  { %2145 = vmatmul.mubr.msk.f32.gmra.mrb[30].mxu1 %vm439_vm0, %v843_v38 }
 0x1c5   :  { %1493 = vmatprep.mubr.f32.mxu1 %v3570_v3 }
 0x279   :  { %v946_v20 = vpop.f32.mrb[16].mxu0 }
 0x27a   :  { %v947_v61 = vadd.f32 %v946_v20, %v3308_v33  ;;  %v948_v26 = vpop.f32.mrb[17].mxu0 }
 0x27b   :  { %v1035_v22 = vpop.f32.mrb[16].mxu1  ;;  %v949_v32 = vadd.f32 %v948_v26, %v3308_v33 }
 0x27c   :  { %2433 = vtanh.f32 %v947_v61  ;;  %v1036_v29 = vadd.f32 %v1035_v22, %v3308_v33  ;;  %v1037_v4 = vpop.f32.mrb[17].mxu1  ;;  %v3319_v22 = vpop.permute.xlu0 %860 }
 0x27d   :  { %2435 = vtanh.f32 %v949_v32  ;;  %v1038_v38 = vadd.f32 %v1037_v4, %v3308_v33  ;;  %v952_v11 = vpop.f32.mrb[18].mxu0 }
 0x27e   :  { %2437 = vtanh.f32 %v1036_v29  ;;  %v953_v35 = vadd.f32 %v952_v11, %v3313_v31  ;;  %v954_v14 = vpop.f32.mrb[19].mxu0 }
 0x27f   :  { %2439 = vtanh.f32 %v1038_v38  ;;  %v1041_v20 = vpop.f32.mrb[18].mxu1  ;;  %v955_v55 = vadd.f32 %v954_v14, %v3313_v31 }
 0x280   :  { %2441 = vtanh.f32 %v953_v35  ;;  %v1042_v61 = vadd.f32 %v1041_v20, %v3313_v31  ;;  %v1043_v26 = vpop.f32.mrb[19].mxu1  ;;  %v3325_v20 = vpop.permute.xlu1 %865 }
 0x281   :  { %2443 = vtanh.f32 %v955_v55  ;;  %v1044_v32 = vadd.f32 %v1043_v26, %v3313_v31  ;;  %v958_v25 = vpop.f32.mrb[20].mxu0 }
 0x282   :  { %2445 = vtanh.f32 %v1042_v61  ;;  %v959_v4 = vadd.f32 %v958_v25, %v3319_v22  ;;  %v960_v29 = vpop.f32.mrb[21].mxu0 }
 0x283   :  { %2447 = vtanh.f32 %v1044_v32  ;;  %v1047_v11 = vpop.f32.mrb[20].mxu1  ;;  %v961_v38 = vadd.f32 %v960_v29, %v3319_v22 }
 0x284   :  { %2449 = vtanh.f32 %v959_v4  ;;  %v1048_v35 = vadd.f32 %v1047_v11, %v3319_v22  ;;  %v1049_v14 = vpop.f32.mrb[21].mxu1 }
 0x285   :  { %2451 = vtanh.f32 %v961_v38  ;;  %v1050_v55 = vadd.f32 %v1049_v14, %v3319_v22  ;;  %v964_v41 = vpop.f32.mrb[22].mxu0 }
 0x286   :  { %v2434_v26 = vpop.eup %2433  ;;  %2453 = vtanh.f32 %v1048_v35  ;;  %v965_v61 = vadd.f32 %v964_v41, %v3325_v20  ;;  %v966_v25 = vpop.f32.mrb[23].mxu0 }
 0x287   :  { %v2436_v51 = vpop.eup %2435  ;;  %2455 = vtanh.f32 %v1050_v55  ;;  %v1053_v32 = vpop.f32.mrb[22].mxu1  ;;  %v967_v29 = vadd.f32 %v966_v25, %v3325_v20  ;;  %v1268_v8 = vadd.f32 %v2434_v26, %v2945_v36 }
 0x288   :  { %v2438_v4 = vpop.eup %2437  ;;  %2457 = vtanh.f32 %v965_v61  ;;  %v1054_v11 = vadd.f32 %v1053_v32, %v3325_v20  ;;  %v1055_v43 = vpop.f32.mrb[23].mxu1  ;;  %v1269_v55 = vadd.f32 %v2436_v51, %v2933_v15 }
 0x289   :  { %v2440_v1 = vpop.eup %2439  ;;  %2459 = vtanh.f32 %v967_v29  ;;  %v1056_v38 = vadd.f32 %v1055_v43, %v3325_v20  ;;  %v1124_v14 = vpop.f32.mrb[24].mxu0  ;;  %v1270_v29 = vadd.f32 %v2438_v4, %v2958_v42 }
 0x28a   :  { %v2442_v39 = vpop.eup %2441  ;;  %2461 = vtanh.f32 %v1054_v11  ;;  %v1125_v41 = vadd.f32 %v1124_v14, %v3308_v33  ;;  %v1126_v35 = vpop.f32.mrb[25].mxu0  ;;  %v1271_v15 = vadd.f32 %v2440_v1, %v2939_v49 }
 0x28b   :  { %v2444_v25 = vpop.eup %2443  ;;  %2463 = vtanh.f32 %v1056_v38  ;;  %v1213_v61 = vpop.f32.mrb[24].mxu1  ;;  %v1127_v32 = vadd.f32 %v1126_v35, %v3308_v33  ;;  %v1276_v6 = vadd.f32 %v2442_v39, %v2952_v12 }
 0x28c   :  { %v2446_v43 = vpop.eup %2445  ;;  %2465 = vtanh.f32 %v1125_v41  ;;  %v1214_v11 = vadd.f32 %v1213_v61, %v3308_v33  ;;  %v1215_v28 = vpop.f32.mrb[25].mxu1  ;;  %v1277_v14 = vadd.f32 %v2444_v25, %v2920_v34 }
 0x28d   :  { %v2448_v51 = vpop.eup %2447  ;;  %2467 = vtanh.f32 %v1127_v32  ;;  %v1216_v36 = vadd.f32 %v1215_v28, %v3308_v33  ;;  %v1130_v26 = vpop.f32.mrb[26].mxu0  ;;  %v2232_v38 = vpack.c.bf16 %v1276_v6, %v1268_v8  ;;  %v1278_v35 = vadd.f32 %v2446_v43, %v2966_v46 }
 0x28e   :  { %v2450_v12 = vpop.eup %2449  ;;  %2469 = vtanh.f32 %v1214_v11  ;;  %v1131_v42 = vadd.f32 %v1130_v26, %v3313_v31  ;;  %v1132_v39 = vpop.f32.mrb[27].mxu0  ;;  %v2230_v4 = vpack.c.bf16 %v1277_v14, %v1269_v55  ;;  %v1279_v41 = vadd.f32 %v2448_v51, %v2926_v63 }
 0x28f   :  { %v2452_v61 = vpop.eup %2451  ;;  %2471 = vtanh.f32 %v1216_v36  ;;  %v1219_v34 = vpop.f32.mrb[26].mxu1  ;;  %v1133_v49 = vadd.f32 %v1132_v39, %v3313_v31  ;;  %v2240_v1 = vpack.c.bf16 %v1278_v35, %v1270_v29  ;;  %v1284_v11 = vadd.f32 %v2450_v12, %v2996_v62 }
 0x290   :  { %v2454_v25 = vpop.eup %2453  ;;  %2473 = vtanh.f32 %v1131_v42  ;;  %v1220_v6 = vadd.f32 %v1219_v34, %v3313_v31  ;;  %v1221_v28 = vpop.f32.mrb[27].mxu1  ;;  %2231 = vmatprep.subr.bf16.mxu0 %v2230_v4  ;;  %v2238_v46 = vpack.c.bf16 %v1279_v41, %v1271_v15  ;;  %v1285_v29 = vadd.f32 %v2452_v61, %v2974_v2 }
 0x291   :  { %v2456_v8 = vpop.eup %2455  ;;  %2475 = vtanh.f32 %v1133_v49  ;;  %v1222_v33 = vadd.f32 %v1221_v28, %v3313_v31  ;;  %v1136_v55 = vpop.f32.mrb[28].mxu0  ;;  %2233 = vmatpush1.bf16.msra.mxu0 %v2232_v38  ;;  %v1286_v36 = vadd.f32 %v2454_v25, %v3010_v19 }
 0x292   :  { %v2458_v63 = vpop.eup %2457  ;;  %2477 = vtanh.f32 %v1220_v6  ;;  %2239 = vmatprep.subr.bf16.mxu1 %v2238_v46  ;;  %v1137_v32 = vadd.f32 %v1136_v55, %v3319_v22  ;;  %v1138_v43 = vpop.f32.mrb[29].mxu0  ;;  %v1287_v2 = vadd.f32 %v2456_v8, %v2980_v47 }
 0x293   :  { %v2460_v14 = vpop.eup %2459  ;;  %2479 = vtanh.f32 %v1222_v33  ;;  %v1225_v51 = vpop.f32.mrb[28].mxu1  ;;  %2241 = vmatpush1.bf16.msra.mxu1 %v2240_v1  ;;  %v1139_v15 = vadd.f32 %v1138_v43, %v3319_v22  ;;  %v1292_v31 = vadd.f32 %v2458_v63, %v3003_v18 }
 0x294   :  { %v2462_v26 = vpop.eup %2461  ;;  %2481 = vtanh.f32 %v1137_v32  ;;  %v1226_v38 = vadd.f32 %v1225_v51, %v3319_v22  ;;  %v1227_v35 = vpop.f32.mrb[29].mxu1  ;;  %v1293_v42 = vadd.f32 %v2460_v14, %v2985_v13  ;;  %v1301_v14 = vld [vmem:[%s3531_s7 + $0x8] sm:$0xff] }
 0x295   :  { %v2464_v62 = vpop.eup %2463  ;;  %2483 = vtanh.f32 %v1139_v15  ;;  %v1228_v12 = vadd.f32 %v1227_v35, %v3319_v22  ;;  %v1142_v39 = vpop.f32.mrb[30].mxu0  ;;  %v2236_v4 = vpack.c.bf16 %v1292_v31, %v1284_v11  ;;  %v1294_v41 = vadd.f32 %v2462_v26, %v3017_v57 }
 0x296   :  { %v2466_v18 = vpop.eup %2465  ;;  %2485 = vtanh.f32 %v1226_v38  ;;  %v1143_v19 = vadd.f32 %v1142_v39, %v3325_v20  ;;  %v1144_v61 = vpop.f32.mrb[31].mxu0  ;;  %v2234_v34 = vpack.c.bf16 %v1293_v42, %v1285_v29  ;;  %v1295_v49 = vadd.f32 %v2464_v62, %v2991_v10  ;;  %v3367_v10 = vld [vmem:[%s3531_s7] sm:$0xff] }
 0x297   :  { %v2468_v1 = vpop.eup %2467  ;;  %2487 = vtanh.f32 %v1228_v12  ;;  %v1231_v13 = vpop.f32.mrb[30].mxu1  ;;  %v1145_v47 = vadd.f32 %v1144_v61, %v3325_v20  ;;  %v2244_v25 = vpack.c.bf16 %v1294_v41, %v1286_v36  ;;  %v1272_v63 = vadd.f32 %v2466_v18, %v3041_v58  ;;  %v1303_v41 = vld [vmem:[%s3531_s7 + $0x18] sm:$0xff] }
 0x298   :  { %v2470_v6 = vpop.eup %2469  ;;  %2489 = vtanh.f32 %v1143_v19  ;;  %v1232_v22 = vadd.f32 %v1231_v13, %v3325_v20  ;;  %v1233_v28 = vpop.f32.mrb[31].mxu1  ;;  %2235 = vmatprep.subr.bf16.mxu0 %v2234_v34  ;;  %v2242_v57 = vpack.c.bf16 %v1295_v49, %v1287_v2 }
 0x299   :  { %v2472_v46 = vpop.eup %2471  ;;  %2491 = vtanh.f32 %v1145_v47  ;;  %v1234_v8 = vadd.f32 %v1233_v28, %v3325_v20  ;;  %2237 = vmatpush1.bf16.msra.mxu0 %v2236_v4  ;;  %v1273_v20 = vadd.f32 %v2468_v1, %v3020_v0  ;;  %v1274_v58 = vadd.f32 %v2470_v6, %v3053_v53 }
 0x29a   :  { %v2474_v33 = vpop.eup %2473  ;;  %2493 = vtanh.f32 %v1232_v22  ;;  %2243 = vmatprep.subr.bf16.mxu1 %v2242_v57  ;;  %v1275_v0 = vadd.f32 %v2472_v46, %v3033_v27 }
 0x29b   :  { %v2476_v55 = vpop.eup %2475  ;;  %2495 = vtanh.f32 %v1234_v8  ;;  %2245 = vmatpush1.bf16.msra.mxu1 %v2244_v25  ;;  %v1280_v32 = vadd.f32 %v2474_v33, %v3049_v44  ;;  %v3435_v25 = vpop.permute.xlu1 %1315 }
 0x29c   :  { %v2478_v43 = vpop.eup %2477  ;;  %2146 = vmatmul.mubr.msk.f32.vlgmr.msra.gmra.mrb[32].mxu0 %vm439_vm0, %v3367_v10  ;;  %v1281_v29 = vadd.f32 %v2476_v55, %v3030_v48 }
 0x29d   :  { %v2480_v11 = vpop.eup %2479  ;;  %1410 = vmatprep.mubr.f32.mxu0 %v3570_v3  ;;  %v2248_v51 = vpack.c.bf16 %v1280_v32, %v1272_v63  ;;  %v1282_v44 = vadd.f32 %v2478_v43, %v3058_v23  ;;  %v1302_v23 = vld [vmem:[%s3531_s7 + $0x10] sm:$0xff] }
 0x29e   :  { %v2482_v15 = vpop.eup %2481  ;;  %2150 = vmatmul.mubr.msk.f32.vlgmr.msra.gmra.mrb[32].mxu1 %vm439_vm0, %v3367_v10  ;;  %v2246_v31 = vpack.c.bf16 %v1281_v29, %v1273_v20  ;;  %v1283_v48 = vadd.f32 %v2480_v11, %v3037_v52 }
 0x29f   :  { %v2484_v36 = vpop.eup %2483  ;;  %1499 = vmatprep.mubr.f32.mxu1 %v3570_v3  ;;  %v2256_v26 = vpack.c.bf16 %v1282_v44, %v1274_v58  ;;  %v1288_v42 = vadd.f32 %v2482_v15, %v3080_v40  ;;  %v3447_v58 = vpop.permute.xlu1 %1325 }
 0x2a0   :  { %v2486_v38 = vpop.eup %2485  ;;  %2147 = vmatmul.mubr.msk.f32.gmra.mrb[34].mxu0 %vm439_vm0, %v1301_v14  ;;  %2247 = vmatprep.subr.bf16.mxu0 %v2246_v31  ;;  %v2254_v53 = vpack.c.bf16 %v1283_v48, %v1275_v0  ;;  %v1289_v12 = vadd.f32 %v2484_v36, %v3061_v16 }
 0x2a1   :  { %v2488_v35 = vpop.eup %2487  ;;  %2249 = vmatpush1.bf16.msra.mxu0 %v2248_v51  ;;  %1416 = vmatprep.mubr.f32.mxu0 %v3570_v3  ;;  %v1290_v19 = vadd.f32 %v2486_v38, %v3091_v56 }
 0x2a2   :  { %v2490_v27 = vpop.eup %2489  ;;  %2151 = vmatmul.mubr.msk.f32.gmra.mrb[34].mxu1 %vm439_vm0, %v1301_v14  ;;  %2255 = vmatprep.subr.bf16.mxu1 %v2254_v53  ;;  %v1291_v61 = vadd.f32 %v2488_v35, %v3072_v60  ;;  %v3430_v60 = vpop.permute.xlu0 %1310 }
 0x2a3   :  { %v2492_v52 = vpop.eup %2491  ;;  %2257 = vmatpush1.bf16.msra.mxu1 %v2256_v26  ;;  %1505 = vmatprep.mubr.f32.mxu1 %v3570_v3  ;;  %v1296_v2 = vadd.f32 %v2490_v27, %v3088_v7 }
 0x2a4   :  { %v2494_v62 = vpop.eup %2493  ;;  %2148 = vmatmul.mubr.msk.f32.gmra.mrb[36].mxu0 %vm439_vm0, %v1302_v23  ;;  %v1297_v39 = vadd.f32 %v2492_v52, %v3069_v5 }
 0x2a5   :  { %v2496_v4 = vpop.eup %2495  ;;  %1422 = vmatprep.mubr.f32.mxu0 %v3570_v3  ;;  %v2252_v18 = vpack.c.bf16 %v1296_v2, %v1288_v42  ;;  %v1298_v40 = vadd.f32 %v2494_v62, %v3096_v30 }
 0x2a6   :  { %2152 = vmatmul.mubr.msk.f32.gmra.mrb[36].mxu1 %vm439_vm0, %v1302_v23  ;;  %v2250_v7 = vpack.c.bf16 %v1297_v39, %v1289_v12  ;;  %v1299_v16 = vadd.f32 %v2496_v4, %v3077_v37  ;;  %v3441_v55 = vpop.permute.xlu0 %1320 }
 0x2a7   :  { %1511 = vmatprep.mubr.f32.mxu1 %v3570_v3  ;;  %v2260_v5 = vpack.c.bf16 %v1298_v40, %v1290_v19 }
 0x2a8   :  { %2149 = vmatmul.mubr.msk.f32.gmra.mrb[38].mxu0 %vm439_vm0, %v1303_v41  ;;  %2251 = vmatprep.subr.bf16.mxu0 %v2250_v7  ;;  %v2258_v34 = vpack.c.bf16 %v1299_v16, %v1291_v61 }
 0x2a9   :  { %2253 = vmatpush1.bf16.msra.mxu0 %v2252_v18  ;;  %1582 = vmatprep.mubr.f32.mxu0 %v3570_v3 }
 0x2aa   :  { %2153 = vmatmul.mubr.msk.f32.gmra.mrb[38].mxu1 %vm439_vm0, %v1303_v41  ;;  %2259 = vmatprep.subr.bf16.mxu1 %v2258_v34 }
 0x2ab   :  { %2261 = vmatpush1.bf16.msra.mxu1 %v2260_v5  ;;  %1671 = vmatprep.mubr.f32.mxu1 %v3570_v3 }
 0x2ac   :  { %2154 = vmatmul.mubr.msk.f32.vlgmr.msra.gmra.mrb[40].mxu0 %vm439_vm0, %v3367_v10 }
 0x2ad   :  { %1588 = vmatprep.mubr.f32.mxu0 %v3570_v3 }
 0x2ae   :  { %2158 = vmatmul.mubr.msk.f32.vlgmr.msra.gmra.mrb[40].mxu1 %vm439_vm0, %v3367_v10 }
 0x2af   :  { %1677 = vmatprep.mubr.f32.mxu1 %v3570_v3 }
 0x2b0   :  { %2155 = vmatmul.mubr.msk.f32.gmra.mrb[42].mxu0 %vm439_vm0, %v1301_v14 }
 0x2b1   :  { %1594 = vmatprep.mubr.f32.mxu0 %v3570_v3 }
 0x2b2   :  { %2159 = vmatmul.mubr.msk.f32.gmra.mrb[42].mxu1 %vm439_vm0, %v1301_v14 }
 0x2b3   :  { %1683 = vmatprep.mubr.f32.mxu1 %v3570_v3 }
 0x2b4   :  { %2156 = vmatmul.mubr.msk.f32.gmra.mrb[44].mxu0 %vm439_vm0, %v1302_v23 }
 0x2b5   :  { %1600 = vmatprep.mubr.f32.mxu0 %v3570_v3 }
 0x2b6   :  { %2160 = vmatmul.mubr.msk.f32.gmra.mrb[44].mxu1 %vm439_vm0, %v1302_v23 }
 0x2b7   :  { %1689 = vmatprep.mubr.f32.mxu1 %v3570_v3 }
 0x2b8   :  { %2157 = vmatmul.mubr.msk.f32.gmra.mrb[46].mxu0 %vm439_vm0, %v1303_v41 }
 0x2b9   :  { %1834 = vmatprep.mubr.f32.mxu0 %v3570_v3 }
 0x2ba   :  { %2161 = vmatmul.mubr.msk.f32.gmra.mrb[46].mxu1 %vm439_vm0, %v1303_v41 }
 0x2bb   :  { %1905 = vmatprep.mubr.f32.mxu1 %v3570_v3 }
 0x36f   :  { %v1406_v37 = vpop.f32.mrb[32].mxu0 }
 0x370   :  { %v1407_v56 = vadd.f32 %v1406_v37, %v3430_v60  ;;  %v1408_v30 = vpop.f32.mrb[33].mxu0 }
 0x371   :  { %v1495_v49 = vpop.f32.mrb[32].mxu1  ;;  %v1409_v1 = vadd.f32 %v1408_v30, %v3430_v60 }
 0x372   :  { %2497 = vtanh.f32 %v1407_v56  ;;  %v1496_v13 = vadd.f32 %v1495_v49, %v3430_v60  ;;  %v1497_v47 = vpop.f32.mrb[33].mxu1 }
 0x373   :  { %2499 = vtanh.f32 %v1409_v1  ;;  %v1498_v6 = vadd.f32 %v1497_v47, %v3430_v60  ;;  %v1412_v22 = vpop.f32.mrb[34].mxu0 }
 0x374   :  { %2501 = vtanh.f32 %v1496_v13  ;;  %v1413_v28 = vadd.f32 %v1412_v22, %v3435_v25  ;;  %v1414_v57 = vpop.f32.mrb[35].mxu0 }
 0x375   :  { %2503 = vtanh.f32 %v1498_v6  ;;  %v1501_v46 = vpop.f32.mrb[34].mxu1  ;;  %v1415_v8 = vadd.f32 %v1414_v57, %v3435_v25 }
 0x376   :  { %2505 = vtanh.f32 %v1413_v28  ;;  %v1502_v10 = vadd.f32 %v1501_v46, %v3435_v25  ;;  %v1503_v33 = vpop.f32.mrb[35].mxu1 }
 0x377   :  { %2507 = vtanh.f32 %v1415_v8  ;;  %v1504_v63 = vadd.f32 %v1503_v33, %v3435_v25  ;;  %v1418_v32 = vpop.f32.mrb[36].mxu0 }
 0x378   :  { %2509 = vtanh.f32 %v1502_v10  ;;  %v1419_v43 = vadd.f32 %v1418_v32, %v3441_v55  ;;  %v1420_v20 = vpop.f32.mrb[37].mxu0  ;;  %v3595_v32 = vld [vmem:[#allocation8_spill] sm:$0xff] }
 0x379   :  { %2511 = vtanh.f32 %v1504_v63  ;;  %v1507_v29 = vpop.f32.mrb[36].mxu1  ;;  %v1421_v11 = vadd.f32 %v1420_v20, %v3441_v55  ;;  %v3596_v20 = vld [vmem:[#allocation6_spill] sm:$0xff] }
 0x37a   :  { %2513 = vtanh.f32 %v1419_v43  ;;  %v1508_v14 = vadd.f32 %v1507_v29, %v3441_v55  ;;  %v1509_v51 = vpop.f32.mrb[37].mxu1 }
 0x37b   :  { %2515 = vtanh.f32 %v1421_v11  ;;  %v1510_v44 = vadd.f32 %v1509_v51, %v3441_v55  ;;  %v1424_v15 = vpop.f32.mrb[38].mxu0 }
 0x37c   :  { %v2498_v31 = vpop.eup %2497  ;;  %2517 = vtanh.f32 %v1508_v14  ;;  %v1425_v0 = vadd.f32 %v1424_v15, %v3447_v58  ;;  %v1426_v48 = vpop.f32.mrb[39].mxu0  ;;  %v3598_v15 = vld [vmem:[#allocation13_spill] sm:$0xff] }
 0x37d   :  { %v2500_v36 = vpop.eup %2499  ;;  %2519 = vtanh.f32 %v1510_v44  ;;  %v1513_v26 = vpop.f32.mrb[38].mxu1  ;;  %v1427_v38 = vadd.f32 %v1426_v48, %v3447_v58  ;;  %v1728_v4 = vadd.f32 %v2498_v31, %v3142_v24  ;;  %v3597_v44 = vld [vmem:[#allocation9_spill] sm:$0xff] }
 0x37e   :  { %v2502_v53 = vpop.eup %2501  ;;  %2521 = vtanh.f32 %v1425_v0  ;;  %v1514_v35 = vadd.f32 %v1513_v26, %v3447_v58  ;;  %v1515_v23 = vpop.f32.mrb[39].mxu1  ;;  %v1729_v39 = vadd.f32 %v2500_v36, %v3145_v45  ;;  %v3599_v26 = vld [vmem:[#allocation10_spill] sm:$0xff] }
 0x37f   :  { %v2504_v27 = vpop.eup %2503  ;;  %2523 = vtanh.f32 %v1427_v38  ;;  %v1516_v52 = vadd.f32 %v1515_v23, %v3447_v58  ;;  %v1584_v42 = vpop.f32.mrb[40].mxu0  ;;  %v1730_v7 = vadd.f32 %v2502_v53, %v3167_v9  ;;  %v3600_v53 = vld [vmem:[#allocation7_spill] sm:$0xff] }
 0x380   :  { %v2506_v2 = vpop.eup %2505  ;;  %2525 = vtanh.f32 %v1514_v35  ;;  %v1585_v62 = vadd.f32 %v1584_v42, %v3430_v60  ;;  %v1586_v12 = vpop.f32.mrb[41].mxu0  ;;  %v1731_v45 = vadd.f32 %v2504_v27, %v3149_v54 }
 0x381   :  { %v2508_v41 = vpop.eup %2507  ;;  %2527 = vtanh.f32 %v1516_v52  ;;  %v1673_v18 = vpop.f32.mrb[40].mxu1  ;;  %v1587_v19 = vadd.f32 %v1586_v12, %v3430_v60  ;;  %v1736_v40 = vadd.f32 %v2506_v2, %v3152_v59  ;;  %v3601_v2 = vld [vmem:[#allocation11_spill] sm:$0xff] }
 0x382   :  { %v2510_v61 = vpop.eup %2509  ;;  %2529 = vtanh.f32 %v1585_v62  ;;  %v1674_v16 = vadd.f32 %v1673_v18, %v3430_v60  ;;  %v1675_v5 = vpop.f32.mrb[41].mxu1  ;;  %v1737_v34 = vadd.f32 %v2508_v41, %v3155_v21  ;;  %v3602_v18 = vld [vmem:[#allocation12_spill] sm:$0xff] }
 0x383   :  { %v2512_v37 = vpop.eup %2511  ;;  %2531 = vtanh.f32 %v1587_v19  ;;  %v1676_v24 = vadd.f32 %v1675_v5, %v3430_v60  ;;  %v1590_v56 = vpop.f32.mrb[42].mxu0  ;;  %v2264_v30 = vpack.c.bf16 %v1736_v40, %v1728_v4  ;;  %v1738_v49 = vadd.f32 %v2510_v61, %v3158_v17 }
 0x384   :  { %v2514_v59 = vpop.eup %2513  ;;  %2533 = vtanh.f32 %v1674_v16  ;;  %v1591_v9 = vadd.f32 %v1590_v56, %v3435_v25  ;;  %v1592_v1 = vpop.f32.mrb[43].mxu0  ;;  %v2262_v13 = vpack.c.bf16 %v1737_v34, %v1729_v39  ;;  %v1739_v47 = vadd.f32 %v2512_v37, %v3162_v50  ;;  %v1760_v56 = vld [vmem:[%s3533_s9] sm:$0x3]  ;;  %s2589_s9 = smov [#allocation2]  }
 0x385   :  { %v2516_v6 = vpop.eup %2515  ;;  %2535 = vtanh.f32 %v1676_v24  ;;  %v1679_v21 = vpop.f32.mrb[42].mxu1  ;;  %v1593_v54 = vadd.f32 %v1592_v1, %v3435_v25  ;;  %v2272_v22 = vpack.c.bf16 %v1738_v49, %v1730_v7  ;;  %v1744_v29 = vadd.f32 %v2514_v59, %v3596_v20  ;;  %v3603_v59 = vld [vmem:[#allocation14_spill] sm:$0xff]  ;;  %v3604_v1 = vld [vmem:[#allocation17_spill] sm:$0xff]  ;;  %s2106_s10 = sshll.u32 %s2589_s9, 4  ;;  %s2107_s10 = int_to_ptr.vmem [resolvable:$true] %s2106_s10 }
 0x386   :  { %v2518_v28 = vpop.eup %2517  ;;  %2537 = vtanh.f32 %v1591_v9  ;;  %v1680_v60 = vadd.f32 %v1679_v21, %v3435_v25  ;;  %v1681_v57 = vpop.f32.mrb[43].mxu1  ;;  %2263 = vmatprep.subr.bf16.mxu0 %v2262_v13  ;;  %v2270_v17 = vpack.c.bf16 %v1739_v47, %v1731_v45  ;;  %v1745_v43 = vadd.f32 %v2516_v6, %v3595_v32  ;;  %v3605_v6 = vld [vmem:[#allocation15_spill] sm:$0xff]  ;;  %v3606_v21 = vld [vmem:[#allocation18_spill] sm:$0xff]  ;;  %s2561_s8 = scalar_lea.vmem %s2107_s10, 256  ;;  %p2566_p1 = scmp.lt.s32.totalorder %s2107_s10, %s2107_s10 }
 0x387   :  { %v2520_v46 = vpop.eup %2519  ;;  %2539 = vtanh.f32 %v1593_v54  ;;  %v1682_v8 = vadd.f32 %v1681_v57, %v3435_v25  ;;  %v1596_v10 = vpop.f32.mrb[44].mxu0  ;;  %2265 = vmatpush1.bf16.msra.mxu0 %v2264_v30  ;;  %v1746_v31 = vadd.f32 %v2518_v28, %v3598_v15  ;;  %p2562_p0 = scmp.ne.s32.totalorder %s2107_s10, %s2561_s8  ;;  %p2567_p2 = scmp.lt.s32.totalorder %s2561_s8, %s2561_s8 }
 0x388   :  { %v2522_v50 = vpop.eup %2521  ;;  %2541 = vtanh.f32 %v1680_v60  ;;  %2271 = vmatprep.subr.bf16.mxu1 %v2270_v17  ;;  %v1597_v33 = vadd.f32 %v1596_v10, %v3441_v55  ;;  %v1598_v63 = vpop.f32.mrb[45].mxu0  ;;  %v1747_v35 = vadd.f32 %v2520_v46, %v3600_v53  ;;  %v3607_v60 = vld [vmem:[#allocation21_spill] sm:$0xff]  ;;  %v3608_v17 = vld [vmem:[#allocation19_spill] sm:$0xff] }
 0x389   :  { %v2524_v11 = vpop.eup %2523  ;;  %2543 = vtanh.f32 %v1682_v8  ;;  %v1685_v14 = vpop.f32.mrb[44].mxu1  ;;  %2273 = vmatpush1.bf16.msra.mxu1 %v2272_v22  ;;  %v1599_v51 = vadd.f32 %v1598_v63, %v3441_v55  ;;  %v1752_v25 = vadd.f32 %v2522_v50, %v3597_v44  ;;  %v3609_v50 = vld [vmem:[#allocation16_spill] sm:$0xff]  ;;  %p2568_p3 = por %p2567_p2, %p2566_p1 }
 0x38a   :  { %v2526_v0 = vpop.eup %2525  ;;  %2545 = vtanh.f32 %v1597_v33  ;;  %v1686_v48 = vadd.f32 %v1685_v14, %v3441_v55  ;;  %v1687_v36 = vpop.f32.mrb[45].mxu1  ;;  %v1753_v38 = vadd.f32 %v2524_v11, %v3599_v26  ;;  %v3610_v63 = vld [vmem:[#allocation20_spill] sm:$0xff] }
 0x38b   :  { %v2528_v23 = vpop.eup %2527  ;;  %2547 = vtanh.f32 %v1599_v51  ;;  %v1688_v27 = vadd.f32 %v1687_v36, %v3441_v55  ;;  %v1602_v52 = vpop.f32.mrb[46].mxu0  ;;  %v2268_v42 = vpack.c.bf16 %v1752_v25, %v1744_v29  ;;  %v1754_v62 = vadd.f32 %v2526_v0, %v3601_v2  ;;  %v3611_v25 = vld [vmem:[#allocation22_spill] sm:$0xff]  ;;  %v3613_v36 = vld [vmem:[#allocation23_spill] sm:$0xff]  ;;  %p2569_p4 = pnand %p2568_p3, %p2562_p0 }
 0x38c   :  { %v2530_v12 = vpop.eup %2529  ;;  %2549 = vtanh.f32 %v1686_v48  ;;  %v1603_v39 = vadd.f32 %v1602_v52, %v3447_v58  ;;  %v1604_v4 = vpop.f32.mrb[47].mxu0  ;;  %v2266_v41 = vpack.c.bf16 %v1753_v38, %v1745_v43  ;;  %v1755_v19 = vadd.f32 %v2528_v23, %v3602_v18  ;;  %v3614_v38 = vld [vmem:[#allocation26_spill] sm:$0xff]  ;;  %v3615_v23 = vld [vmem:[#allocation29_spill] sm:$0xff]  ;;  %v3616_v52 = vld [vmem:[#allocation27_spill] sm:$0xff] }
 0x38d   :  { %v2532_v40 = vpop.eup %2531  ;;  %2551 = vtanh.f32 %v1688_v27  ;;  %v1691_v7 = vpop.f32.mrb[46].mxu1  ;;  %v1605_v61 = vadd.f32 %v1604_v4, %v3447_v58  ;;  %v2276_v16 = vpack.c.bf16 %v1754_v62, %v1746_v31  ;;  %v1732_v9 = vadd.f32 %v2530_v12, %v3603_v59  ;;  %v3612_v31 = vld [vmem:[#allocation25_spill] sm:$0xff]  ;;  %v3617_v62 = vld [vmem:[#allocation24_spill] sm:$0xff] }
 0x38e   :  { %v2534_v5 = vpop.eup %2533  ;;  %2553 = vtanh.f32 %v1603_v39  ;;  %v1692_v55 = vadd.f32 %v1691_v7, %v3447_v58  ;;  %v1693_v34 = vpop.f32.mrb[47].mxu1  ;;  %2267 = vmatprep.subr.bf16.mxu0 %v2266_v41  ;;  %v2274_v45 = vpack.c.bf16 %v1755_v19, %v1747_v35  ;;  %v3618_v39 = vld [vmem:[#allocation28_spill] sm:$0xff]  ;;  %v2588_v19 = vmov 1983009808  }
 0x38f   :  { %v2536_v37 = vpop.eup %2535  ;;  %2555 = vtanh.f32 %v1605_v61  ;;  %v1694_v24 = vadd.f32 %v1693_v34, %v3447_v58  ;;  %2269 = vmatpush1.bf16.msra.mxu0 %v2268_v42  ;;  %v1733_v58 = vadd.f32 %v2532_v40, %v3605_v6  ;;  %v1734_v57 = vadd.f32 %v2534_v5, %v3607_v60  ;;  %v1765_v61 = vpop.permute.xlu0 %1764 }
 0x390   :  { %v2538_v30 = vpop.eup %2537  ;;  %2557 = vtanh.f32 %v1692_v55  ;;  %2275 = vmatprep.subr.bf16.mxu1 %v2274_v45  ;;  %v1735_v33 = vadd.f32 %v2536_v37, %v3609_v50  ;;  %v2065_v40 = vunpack.c.l.s4 %v2588_v19  ;;  %v3619_v37 = vld [vmem:[#allocation5_spill] sm:$0xff] }
 0x391   :  { %v2540_v49 = vpop.eup %2539  ;;  %2559 = vtanh.f32 %v1694_v24  ;;  %2277 = vmatpush1.bf16.msra.mxu1 %v2276_v16  ;;  %v1740_v13 = vadd.f32 %v2538_v30, %v3604_v1 }
 0x392   :  { %v2542_v47 = vpop.eup %2541  ;;  %2162 = vmatmul.mubr.msk.f32.vlgmr.msra.gmra.mrb[48].mxu0 %vm439_vm0, %v1760_v56  ;;  %v1741_v54 = vadd.f32 %v2540_v49, %v3606_v21  ;;  %v2066_v7 = vunpack.c.0.s8 %v2065_v40 }
 0x393   :  { %v2544_v22 = vpop.eup %2543  ;;  %v2280_v28 = vpack.c.bf16 %v1740_v13, %v1732_v9  ;;  %v1742_v46 = vadd.f32 %v2542_v47, %v3608_v17  ;;  %1976 = vmatprep.mubr.f32.mxu0 %v3570_v3 }
 0x394   :  { %v2546_v8 = vpop.eup %2545  ;;  %2163 = vmatmul.mubr.msk.f32.vlgmr.msra.gmra.mrb[48].mxu1 %vm439_vm0, %v1760_v56  ;;  %v2278_v10 = vpack.c.bf16 %v1741_v54, %v1733_v58  ;;  %v1743_v32 = vadd.f32 %v2544_v22, %v3610_v63  ;;  %v2069_v24 = vsub.s32 %v2066_v7, %v3619_v37 }
 0x395   :  { %v2548_v43 = vpop.eup %2547  ;;  %v2288_v20 = vpack.c.bf16 %v1742_v46, %v1734_v57  ;;  %2047 = vmatprep.mubr.f32.mxu1 %v3570_v3  ;;  %v1748_v15 = vadd.f32 %v2546_v8, %v3611_v25 }
 0x396   :  { %v2550_v29 = vpop.eup %2549  ;;  %2279 = vmatprep.subr.bf16.mxu0 %v2278_v10  ;;  %v2286_v11 = vpack.c.bf16 %v1743_v32, %v1735_v33  ;;  %v1749_v26 = vadd.f32 %v2548_v43, %v3613_v36 }
 0x397   :  { %v2552_v14 = vpop.eup %2551  ;;  %2281 = vmatpush1.bf16.msra.mxu0 %v2280_v28  ;;  %v1750_v27 = vadd.f32 %v2550_v29, %v3615_v23 }
 0x398   :  { %v2554_v51 = vpop.eup %2553  ;;  %2287 = vmatprep.subr.bf16.mxu1 %v2286_v11  ;;  %v1751_v12 = vadd.f32 %v2552_v14, %v3617_v62 }
 0x399   :  { %v2556_v44 = vpop.eup %2555  ;;  %2289 = vmatpush1.bf16.msra.mxu1 %v2288_v20  ;;  %v1756_v0 = vadd.f32 %v2554_v51, %v3612_v31 }
 0x39a   :  { %v2558_v48 = vpop.eup %2557  ;;  %v1757_v53 = vadd.f32 %v2556_v44, %v3614_v38 }
 0x39b   :  { %v2560_v35 = vpop.eup %2559  ;;  %v2284_v3 = vpack.c.bf16 %v1756_v0, %v1748_v15  ;;  %v1758_v42 = vadd.f32 %v2558_v48, %v3616_v52 }
 0x39c   :  { %v2282_v2 = vpack.c.bf16 %v1757_v53, %v1749_v26  ;;  %v1759_v4 = vadd.f32 %v2560_v35, %v3618_v39 }
 0x39d   :  { %v2292_v41 = vpack.c.bf16 %v1758_v42, %v1750_v27 }
 0x39e   :  { %2283 = vmatprep.subr.bf16.mxu0 %v2282_v2  ;;  %v2290_v18 = vpack.c.bf16 %v1759_v4, %v1751_v12 }
 0x39f   :  { %2285 = vmatpush1.bf16.msra.mxu0 %v2284_v3 }
 0x3a0   :  { %2291 = vmatprep.subr.bf16.mxu1 %v2290_v18 }
 0x3a1   :  { %2293 = vmatpush1.bf16.msra.mxu1 %v2292_v41 }
 0x3a2   :  { %2164 = vmatmul.mubr.msk.f32.vlgmr.msra.gmra.mrb[50].mxu0 %vm439_vm0, %v1760_v56 }
 0x3a4   :  { %2165 = vmatmul.mubr.msk.f32.vlgmr.msra.gmra.mrb[50].mxu1 %vm439_vm0, %v1760_v56 }
 0x465   :  { %v1836_v16 = vpop.f32.mrb[48].mxu0 }
 0x466   :  { %v1837_v5 = vadd.f32 %v1836_v16, %v1765_v61  ;;  %v1838_v55 = vpop.f32.mrb[49].mxu0 }
 0x467   :  { %v1907_v34 = vpop.f32.mrb[48].mxu1  ;;  %v1839_v45 = vadd.f32 %v1838_v55, %v1765_v61 }
 0x468   :  { %v1908_v30 = vadd.f32 %v1907_v34, %v1765_v61  ;;  %v1909_v49 = vpop.f32.mrb[49].mxu1 }
 0x469   :  { %v2062_v59 = vcombine.low %v1837_v5, %v1839_v45  ;;  %v1910_v9 = vadd.f32 %v1909_v49, %v1765_v61 }
 0x46b   :  { %v2070_v1 = vrot.slane %v2062_v59, %v2069_v24  ;;  %v2063_v13 = vcombine.low %v1908_v30, %v1910_v9 }
 0x46d   :  { %v2077_v47 = vrot.slane %v2063_v13, %v2069_v24 }
 0x46f   :  { %v2078_v6 = vcombine.low %v2070_v1, %v2077_v47 }
 0x471   :  { %2098 = vst [vmem:[#allocation2] sm:$0xff] %v2078_v6 }
 0x475   :  { %v1978_v56 = vpop.f32.mrb[50].mxu0 }
 0x476   :  { %v1979_v58 = vadd.f32 %v1978_v56, %v1765_v61  ;;  %v1980_v21 = vpop.f32.mrb[51].mxu0 }
 0x477   :  { %v2049_v54 = vpop.f32.mrb[50].mxu1  ;;  %v1981_v22 = vadd.f32 %v1980_v21, %v1765_v61 }
 0x478   :  { %v2050_v28 = vadd.f32 %v2049_v54, %v1765_v61  ;;  %v2051_v60 = vpop.f32.mrb[51].mxu1 }
 0x479   :  { %v2079_v57 = vcombine.low %v1979_v58, %v1981_v22  ;;  %v2052_v17 = vadd.f32 %v2051_v60, %v1765_v61 }
 0x47b   :  { %v2087_v46 = vrot.slane %v2079_v57, %v2069_v24  ;;  %v2080_v8 = vcombine.low %v2050_v28, %v2052_v17 }
 0x47d   :  { %v2094_v10 = vrot.slane %v2080_v8, %v2069_v24 }
 0x47f   :  { %v2095_v50 = vcombine.low %v2087_v46, %v2094_v10 }
 0x481   :  { %2099 = vst [vmem:[#allocation2 + $0x8] sm:$0xff] %v2095_v50 }
 0x482   :  { %2572 = shalt.err (!%p2569_p4)
}
 0x483   :  { %s2573_s18 = scalar_lea.hbm %s3535_s11, 256 }
 0x484   :  { %p2574_p5 = scmp.ne.s32.totalorder %s3535_s11, %s2573_s18  ;;  %p2577_p6 = scmp.lt.u32.totalorder %s2573_s18, %s3535_s11 }
 0x486   :  { %p2579_p7 = pnand %p2577_p6, %p2574_p5 }
 0x488   :  { %2582 = shalt.err (!%p2579_p7)
}
 0x489   :  { %2109 = dma.vmem_to_hbm [thread:$0]  %s2107_s10, 256, %s3535_s11, [#allocation3]  }
 0x48a   :  { %2583 = dma.done.wait [#allocation3], 256  }
 0x48b   :  { %2584 = vsyncadd [#allocation3], 4294967040 }
 0x48c   :  { %2113 = vsyncpa [#allocation3], 1 }

</bundles_post_ra>
